<compile_context>
chip_gen: v5e
topology: v5e:2x2
jax: 0.10.0
libtpu: 0.0.40
codegen_flags: <defaults>
</compile_context>

<pallas_src>
import math
import functools

import jax
import jax.numpy as jnp
import numpy as np
from jax.experimental import pallas as pl
from jax.experimental.pallas import tpu as pltpu


# ------------------------------------------------------------------ fused kernel
def _fused_kernel(e_ref, et_ref, m_ref, x_ref, wblk_ref, attn_ref, out_ref, *,
                  num_heads, inv_sqrt):
    N = e_ref.shape[0]          # H*W
    BD = x_ref.shape[1]         # B*D

    e = e_ref[...]              # (N, HW)  f32
    e_t = et_ref[...]           # (HW, N)  f32
    x = x_ref[...]              # (N, B*D) bf16

    acc = jnp.zeros((N, BD), jnp.float32)
    for g in range(num_heads):                       # static unroll, NH is small
        # positional scores for head g: E @ M_g @ E^T  (tiny, kept exact in f32)
        s = jnp.dot(jnp.dot(e, m_ref[g], preferred_element_type=jnp.float32),
                    e_t, preferred_element_type=jnp.float32)            # (N, N)
        mx = jnp.max(s, axis=-1, keepdims=True)
        ex = jnp.exp(s - mx)
        denom = jnp.sum(ex, axis=-1, keepdims=True)
        # fold post-softmax 1/sqrt(hidden) into the (approx, EUP) reciprocal multiply
        p = ex * (inv_sqrt * pl.reciprocal(denom, approx=True))         # (N, N) f32

        # direct lane-slice store of this head's probabilities (no concatenate)
        attn_ref[:, pl.ds(g * N, N)] = p.astype(attn_ref.dtype)

        # apply path on bf16 MXU operands, f32 accumulation:
        #   v[n, b*D+d]     = sum_m p[n,m] * x[b,m,d]
        #   acc[n, b*D+do] += sum_d v[n, b*D+d] * Wf_g[d, do]
        v = jnp.dot(p.astype(jnp.bfloat16), x, preferred_element_type=jnp.float32)
        acc = acc + jnp.dot(v.astype(jnp.bfloat16), wblk_ref[g],
                            preferred_element_type=jnp.float32)
    out_ref[...] = acc.astype(out_ref.dtype)


# ------------------------------------------------------------------ wrapper
def learned_2d_relative_self_attention(x, params, *, num_heads, hidden_size,
                                        max_position_embeddings):
    B, C, Hh, Ww = x.shape
    assert C == hidden_size
    N, D, NH = Hh * Ww, hidden_size, num_heads
    HW = Hh + Ww

    # --- glue: relative-index embedding gather + tiny (P -> NH) key projections ---
    rel_w = (jnp.arange(Ww)[None, :] - jnp.arange(Ww)[:, None]) + max_position_embeddings - 1
    rel_h = (jnp.arange(Hh)[None, :] - jnp.arange(Hh)[:, None]) + max_position_embeddings - 1
    w_emb = params["width_embeddings"][rel_w]                               # (w, w, P)
    h_emb = params["height_embeddings"][rel_h]                              # (h, h, P)
    ws = jnp.einsum("jlp,np->njl", w_emb, params["head_keys_width"])        # (NH, w, w)
    hs = jnp.einsum("ikp,np->nik", h_emb, params["head_keys_height"])       # (NH, h, h)

    # per-head block-diagonal middle matrix  M_g = diag(height_scores_g, width_scores_g)
    m_mid = jnp.zeros((NH, HW, HW), jnp.float32)
    m_mid = m_mid.at[:, :Hh, :Hh].set(hs.astype(jnp.float32))
    m_mid = m_mid.at[:, Hh:, Hh:].set(ws.astype(jnp.float32))

    # constant 0/1 expansion matrices, built host-side (no in-kernel div/mod by W)
    rows = np.arange(N) // Ww
    cols = np.arange(N) % Ww
    e_np = np.zeros((N, HW), np.float32)
    e_np[np.arange(N), rows] = 1.0
    e_np[np.arange(N), Hh + cols] = 1.0
    e = jnp.asarray(e_np)
    e_t = jnp.asarray(np.ascontiguousarray(e_np.T))

    # x with batch stacked along lanes, bf16 for the MXU: (N, B*D)
    x_lanes = jnp.transpose(x, (2, 3, 0, 1)).reshape(N, B * D).astype(jnp.bfloat16)

    # per-head final_value weight slice, block-diagonal over batch: (NH, B*D, B*D), bf16
    wf_heads = params["final_value_weight"].T.reshape(NH, D, D).astype(jnp.float32)
    eye_b = jnp.eye(B, dtype=jnp.float32)
    wblk = (eye_b[None, :, None, :, None] * wf_heads[:, None, :, None, :]
            ).reshape(NH, B * D, B * D).astype(jnp.bfloat16)

    inv_sqrt = 1.0 / math.sqrt(hidden_size)

    flops = NH * (2 * N * HW * HW + 2 * N * N * HW          # score chain
                  + 2 * N * N * B * D                        # PV
                  + 2 * N * (B * D) ** 2)                    # final linear
    bytes_accessed = ((e.size + e_t.size + int(m_mid.size)) * 4
                      + (x_lanes.size + wblk.size) * 2
                      + (N * NH * N + N * B * D) * 4)

    attn_cat, out_lanes = pl.pallas_call(
        functools.partial(_fused_kernel, num_heads=NH, inv_sqrt=inv_sqrt),
        out_shape=(
            jax.ShapeDtypeStruct((N, NH * N), jnp.float32),   # probs, heads along lanes
            jax.ShapeDtypeStruct((N, B * D), jnp.float32),    # output, batch along lanes
        ),
        grid_spec=pl.GridSpec(
            grid=(1,),                                        # everything in one step
            in_specs=[
                pl.BlockSpec((N, HW), lambda i: (0, 0)),
                pl.BlockSpec((HW, N), lambda i: (0, 0)),
                pl.BlockSpec((NH, HW, HW), lambda i: (0, 0, 0)),
                pl.BlockSpec((N, B * D), lambda i: (0, 0)),
                pl.BlockSpec((NH, B * D, B * D), lambda i: (0, 0, 0)),
            ],
            out_specs=(
                pl.BlockSpec((N, NH * N), lambda i: (0, 0)),
                pl.BlockSpec((N, B * D), lambda i: (0, 0)),
            ),
        ),
        compiler_params=pltpu.CompilerParams(dimension_semantics=("arbitrary",)),
        cost_estimate=pl.CostEstimate(flops=int(flops),
                                      transcendentals=int(NH * N * N),
                                      bytes_accessed=int(bytes_accessed)),
    )(e, e_t, m_mid, x_lanes, wblk)

    # bias add + layout restore on the XLA side (fuses with the final transpose)
    output = (jnp.transpose(out_lanes.reshape(Hh, Ww, B, D), (2, 3, 0, 1))
              + params["final_value_bias"][None, :, None, None])          # (B, D, h, w)
    # attn_cat[n, head*N + m] == probs[head, n, m]  ->  direct reshape, no transpose
    attention_probs = attn_cat.reshape(Hh, Ww, NH, Hh, Ww)
    return output, attention_probs


# ------------------------------------------------------------------ pure-JAX reference
def _reference(x, params, *, num_heads, hidden_size, max_position_embeddings):
    B, C, Hh, Ww = x.shape
    rel_w = (jnp.arange(Ww)[None, :] - jnp.arange(Ww)[:, None]) + max_position_embeddings - 1
    rel_h = (jnp.arange(Hh)[None, :] - jnp.arange(Hh)[:, None]) + max_position_embeddings - 1
    w_scores = jnp.einsum("jlp,np->jln", params["width_embeddings"][rel_w],
                          params["head_keys_width"])                  # (w, w, NH)
    h_scores = jnp.einsum("ikp,np->ikn", params["height_embeddings"][rel_h],
                          params["head_keys_height"])                 # (h, h, NH)
    scores = w_scores[None, :, None, :, :] + h_scores[:, None, :, None, :]  # (h, w, h, w, NH)
    scores = jnp.transpose(scores, (0, 1, 4, 2, 3))                         # (h, w, NH, h, w)
    probs = jax.nn.softmax(scores.reshape(Hh, Ww, num_heads, Hh * Ww), axis=-1)
    probs = probs.reshape(Hh, Ww, num_heads, Hh, Ww) / math.sqrt(hidden_size)
    xp = jnp.transpose(x, (0, 2, 3, 1))
    iv = jnp.einsum("ijhkl,bkld->bijhd", probs, xp).reshape(B, Hh, Ww, -1)
    out = iv @ params["final_value_weight"].T + params["final_value_bias"]
    return jnp.transpose(out, (0, 3, 1, 2)), probs


if __name__ == "__main__":
    num_heads = 4
    hidden_size = 32
    max_position_embeddings = 16
    B, Hh, Ww = 2, 8, 8
    P = hidden_size // 2

    key = jax.random.PRNGKey(0)
    k = jax.random.split(key, 7)
    params = {
        "width_embeddings": 0.10 * jax.random.normal(k[0], (2 * max_position_embeddings, P), jnp.float32),
        "height_embeddings": 0.10 * jax.random.normal(k[1], (2 * max_position_embeddings, P), jnp.float32),
        "head_keys_width": 0.10 * jax.random.normal(k[2], (num_heads, P), jnp.float32),
        "head_keys_height": 0.10 * jax.random.normal(k[3], (num_heads, P), jnp.float32),
        "final_value_weight": 0.05 * jax.random.normal(k[4], (hidden_size, num_heads * hidden_size), jnp.float32),
        "final_value_bias": 0.05 * jax.random.normal(k[5], (hidden_size,), jnp.float32),
    }
    x = jax.random.normal(k[6], (B, hidden_size, Hh, Ww), jnp.float32)

    out, attn_probs = learned_2d_relative_self_attention(
        x, params, num_heads=num_heads, hidden_size=hidden_size,
        max_position_embeddings=max_position_embeddings)
    out = jax.block_until_ready(out)
    attn_probs = jax.block_until_ready(attn_probs)

    assert out.shape == (B, hidden_size, Hh, Ww)
    assert attn_probs.shape == (Hh, Ww, num_heads, Hh, Ww)

    ref_out, ref_probs = _reference(x, params, num_heads=num_heads, hidden_size=hidden_size,
                                    max_position_embeddings=max_position_embeddings)
    # probs: f32 everywhere except the EUP approximate reciprocal (per perf review).
    np.testing.assert_allclose(np.asarray(attn_probs), np.asarray(ref_probs), rtol=5e-3, atol=1e-6)
    # output: apply path uses bf16 MXU operands with f32 accumulation (per perf review),
    # so the tolerance reflects bf16 operand rounding.
    np.testing.assert_allclose(np.asarray(out), np.asarray(ref_out), rtol=1e-2, atol=1e-3)

    print("KERNEL_OK")
</pallas_src>

<mosaic_0001>
module attributes {stable_mosaic.version = 11 : i64} {
  func.func @_fused_kernel(%arg0: i32, %arg1: memref<64x16xf32, #tpu.memory_space<vmem>>, %arg2: memref<16x64xf32, #tpu.memory_space<vmem>>, %arg3: memref<4x16x16xf32, #tpu.memory_space<vmem>>, %arg4: memref<64x64xbf16, #tpu.memory_space<vmem>>, %arg5: memref<4x64x64xbf16, #tpu.memory_space<vmem>>, %arg6: memref<64x256xf32, #tpu.memory_space<vmem>>, %arg7: memref<64x64xf32, #tpu.memory_space<vmem>>) attributes {dimension_semantics = [#tpu.dimension_semantics<arbitrary>], iteration_bounds = array<i64: 1>, scalar_prefetch = 0 : i64, scratch_operands = 0 : i64, tpu.core_type = #tpu.core_type<tc>, window_params = [{pipeline_mode = #tpu.pipeline_mode<synchronous>, transform_indices = @transform_0, window_bounds = array<i64: 64, 16>}, {pipeline_mode = #tpu.pipeline_mode<synchronous>, transform_indices = @transform_1, window_bounds = array<i64: 16, 64>}, {pipeline_mode = #tpu.pipeline_mode<synchronous>, transform_indices = @transform_2, window_bounds = array<i64: 4, 16, 16>}, {pipeline_mode = #tpu.pipeline_mode<synchronous>, transform_indices = @transform_3, window_bounds = array<i64: 64, 64>}, {pipeline_mode = #tpu.pipeline_mode<synchronous>, transform_indices = @transform_4, window_bounds = array<i64: 4, 64, 64>}, {pipeline_mode = #tpu.pipeline_mode<synchronous>, transform_indices = @transform_5, window_bounds = array<i64: 64, 256>}, {pipeline_mode = #tpu.pipeline_mode<synchronous>, transform_indices = @transform_6, window_bounds = array<i64: 64, 64>}]} {
    %c0 = arith.constant 0 : index
    %c0_0 = arith.constant 0 : index
    %0 = vector.load %arg1[%c0, %c0_0] : memref<64x16xf32, #tpu.memory_space<vmem>>, vector<64x16xf32>
    %c0_1 = arith.constant 0 : index
    %c0_2 = arith.constant 0 : index
    %1 = vector.load %arg2[%c0_1, %c0_2] : memref<16x64xf32, #tpu.memory_space<vmem>>, vector<16x64xf32>
    %c0_3 = arith.constant 0 : index
    %c0_4 = arith.constant 0 : index
    %2 = vector.load %arg4[%c0_3, %c0_4] : memref<64x64xbf16, #tpu.memory_space<vmem>>, vector<64x64xbf16>
    %cst = arith.constant 0.000000e+00 : f32
    %3 = vector.broadcast %cst : f32 to vector<64x64xf32>
    %c0_5 = arith.constant 0 : index
    %c0_6 = arith.constant 0 : index
    %c0_7 = arith.constant 0 : index
    %4 = vector.load %arg3[%c0_5, %c0_6, %c0_7] : memref<4x16x16xf32, #tpu.memory_space<vmem>>, vector<1x16x16xf32>
    %5 = vector.shape_cast %4 : vector<1x16x16xf32> to vector<16x16xf32>
    %cst_8 = arith.constant dense<0.000000e+00> : vector<64x16xf32>
    %6 = tpu.matmul %0, %5, %cst_8 {dimension_numbers = #tpu.dot_dimension_numbers<[1], [0], [0], [1], [0, 0, 1, 1], [], []>} : vector<64x16xf32>, vector<16x16xf32>, vector<64x16xf32> -> vector<64x16xf32>
    %cst_9 = arith.constant dense<0.000000e+00> : vector<64x64xf32>
    %7 = tpu.matmul %6, %1, %cst_9 {dimension_numbers = #tpu.dot_dimension_numbers<[1], [0], [0], [1], [0, 0, 1, 1], [], []>} : vector<64x16xf32>, vector<16x64xf32>, vector<64x64xf32> -> vector<64x64xf32>
    %cst_10 = arith.constant dense<0xFF800000> : vector<64xf32>
    %8 = vector.multi_reduction <maximumf>, %7, %cst_10 [1] : vector<64x64xf32> to vector<64xf32>
    %9 = vector.shape_cast %8 : vector<64xf32> to vector<64x1xf32>
    %10 = vector.broadcast %9 : vector<64x1xf32> to vector<64x64xf32>
    %11 = arith.subf %7, %10 : vector<64x64xf32>
    %12 = math.exp %11 : vector<64x64xf32>
    %cst_11 = arith.constant dense<0.000000e+00> : vector<64xf32>
    %13 = vector.multi_reduction <add>, %12, %cst_11 [1] : vector<64x64xf32> to vector<64xf32>
    %14 = vector.shape_cast %13 : vector<64xf32> to vector<64x1xf32>
    %15 = tpu.reciprocal %14 {approx = true} : vector<64x1xf32> -> vector<64x1xf32>
    %cst_12 = arith.constant 0.176776692 : f32
    %16 = vector.broadcast %cst_12 : f32 to vector<64x1xf32>
    %17 = arith.mulf %16, %15 : vector<64x1xf32>
    %18 = vector.broadcast %17 : vector<64x1xf32> to vector<64x64xf32>
    %19 = arith.mulf %12, %18 : vector<64x64xf32>
    %c0_13 = arith.constant 0 : index
    %c0_14 = arith.constant 0 : index
    %20 = vector.load %arg6[%c0_13, %c0_14] : memref<64x256xf32, #tpu.memory_space<vmem>>, vector<64x64xf32>
    tpu.vector_store %arg6[%c0_13, %c0_14], %19 {strides = array<i32>} : memref<64x256xf32, #tpu.memory_space<vmem>>, vector<64x64xf32>,
    %21 = arith.truncf %19 : vector<64x64xf32> to vector<64x64xbf16>
    %cst_15 = arith.constant dense<0.000000e+00> : vector<64x64xf32>
    %22 = tpu.matmul %21, %2, %cst_15 {dimension_numbers = #tpu.dot_dimension_numbers<[1], [0], [0], [1], [0, 0, 1, 1], [], []>} : vector<64x64xbf16>, vector<64x64xbf16>, vector<64x64xf32> -> vector<64x64xf32>
    %23 = arith.truncf %22 : vector<64x64xf32> to vector<64x64xbf16>
    %c0_16 = arith.constant 0 : index
    %c0_17 = arith.constant 0 : index
    %c0_18 = arith.constant 0 : index
    %24 = vector.load %arg5[%c0_16, %c0_17, %c0_18] : memref<4x64x64xbf16, #tpu.memory_space<vmem>>, vector<1x64x64xbf16>
    %25 = vector.shape_cast %24 : vector<1x64x64xbf16> to vector<64x64xbf16>
    %cst_19 = arith.constant dense<0.000000e+00> : vector<64x64xf32>
    %26 = tpu.matmul %23, %25, %cst_19 {dimension_numbers = #tpu.dot_dimension_numbers<[1], [0], [0], [1], [0, 0, 1, 1], [], []>} : vector<64x64xbf16>, vector<64x64xbf16>, vector<64x64xf32> -> vector<64x64xf32>
    %27 = arith.addf %3, %26 : vector<64x64xf32>
    %c1 = arith.constant 1 : index
    %c0_20 = arith.constant 0 : index
    %c0_21 = arith.constant 0 : index
    %28 = vector.load %arg3[%c1, %c0_20, %c0_21] : memref<4x16x16xf32, #tpu.memory_space<vmem>>, vector<1x16x16xf32>
    %29 = vector.shape_cast %28 : vector<1x16x16xf32> to vector<16x16xf32>
    %cst_22 = arith.constant dense<0.000000e+00> : vector<64x16xf32>
    %30 = tpu.matmul %0, %29, %cst_22 {dimension_numbers = #tpu.dot_dimension_numbers<[1], [0], [0], [1], [0, 0, 1, 1], [], []>} : vector<64x16xf32>, vector<16x16xf32>, vector<64x16xf32> -> vector<64x16xf32>
    %cst_23 = arith.constant dense<0.000000e+00> : vector<64x64xf32>
    %31 = tpu.matmul %30, %1, %cst_23 {dimension_numbers = #tpu.dot_dimension_numbers<[1], [0], [0], [1], [0, 0, 1, 1], [], []>} : vector<64x16xf32>, vector<16x64xf32>, vector<64x64xf32> -> vector<64x64xf32>
    %cst_24 = arith.constant dense<0xFF800000> : vector<64xf32>
    %32 = vector.multi_reduction <maximumf>, %31, %cst_24 [1] : vector<64x64xf32> to vector<64xf32>
    %33 = vector.shape_cast %32 : vector<64xf32> to vector<64x1xf32>
    %34 = vector.broadcast %33 : vector<64x1xf32> to vector<64x64xf32>
    %35 = arith.subf %31, %34 : vector<64x64xf32>
    %36 = math.exp %35 : vector<64x64xf32>
    %cst_25 = arith.constant dense<0.000000e+00> : vector<64xf32>
    %37 = vector.multi_reduction <add>, %36, %cst_25 [1] : vector<64x64xf32> to vector<64xf32>
    %38 = vector.shape_cast %37 : vector<64xf32> to vector<64x1xf32>
    %39 = tpu.reciprocal %38 {approx = true} : vector<64x1xf32> -> vector<64x1xf32>
    %cst_26 = arith.constant 0.176776692 : f32
    %40 = vector.broadcast %cst_26 : f32 to vector<64x1xf32>
    %41 = arith.mulf %40, %39 : vector<64x1xf32>
    %42 = vector.broadcast %41 : vector<64x1xf32> to vector<64x64xf32>
    %43 = arith.mulf %36, %42 : vector<64x64xf32>
    %c0_27 = arith.constant 0 : index
    %c64 = arith.constant 64 : index
    %44 = vector.load %arg6[%c0_27, %c64] : memref<64x256xf32, #tpu.memory_space<vmem>>, vector<64x64xf32>
    tpu.vector_store %arg6[%c0_27, %c64], %43 {strides = array<i32>} : memref<64x256xf32, #tpu.memory_space<vmem>>, vector<64x64xf32>,
    %45 = arith.truncf %43 : vector<64x64xf32> to vector<64x64xbf16>
    %cst_28 = arith.constant dense<0.000000e+00> : vector<64x64xf32>
    %46 = tpu.matmul %45, %2, %cst_28 {dimension_numbers = #tpu.dot_dimension_numbers<[1], [0], [0], [1], [0, 0, 1, 1], [], []>} : vector<64x64xbf16>, vector<64x64xbf16>, vector<64x64xf32> -> vector<64x64xf32>
    %47 = arith.truncf %46 : vector<64x64xf32> to vector<64x64xbf16>
    %c1_29 = arith.constant 1 : index
    %c0_30 = arith.constant 0 : index
    %c0_31 = arith.constant 0 : index
    %48 = vector.load %arg5[%c1_29, %c0_30, %c0_31] : memref<4x64x64xbf16, #tpu.memory_space<vmem>>, vector<1x64x64xbf16>
    %49 = vector.shape_cast %48 : vector<1x64x64xbf16> to vector<64x64xbf16>
    %cst_32 = arith.constant dense<0.000000e+00> : vector<64x64xf32>
    %50 = tpu.matmul %47, %49, %cst_32 {dimension_numbers = #tpu.dot_dimension_numbers<[1], [0], [0], [1], [0, 0, 1, 1], [], []>} : vector<64x64xbf16>, vector<64x64xbf16>, vector<64x64xf32> -> vector<64x64xf32>
    %51 = arith.addf %27, %50 : vector<64x64xf32>
    %c2 = arith.constant 2 : index
    %c0_33 = arith.constant 0 : index
    %c0_34 = arith.constant 0 : index
    %52 = vector.load %arg3[%c2, %c0_33, %c0_34] : memref<4x16x16xf32, #tpu.memory_space<vmem>>, vector<1x16x16xf32>
    %53 = vector.shape_cast %52 : vector<1x16x16xf32> to vector<16x16xf32>
    %cst_35 = arith.constant dense<0.000000e+00> : vector<64x16xf32>
    %54 = tpu.matmul %0, %53, %cst_35 {dimension_numbers = #tpu.dot_dimension_numbers<[1], [0], [0], [1], [0, 0, 1, 1], [], []>} : vector<64x16xf32>, vector<16x16xf32>, vector<64x16xf32> -> vector<64x16xf32>
    %cst_36 = arith.constant dense<0.000000e+00> : vector<64x64xf32>
    %55 = tpu.matmul %54, %1, %cst_36 {dimension_numbers = #tpu.dot_dimension_numbers<[1], [0], [0], [1], [0, 0, 1, 1], [], []>} : vector<64x16xf32>, vector<16x64xf32>, vector<64x64xf32> -> vector<64x64xf32>
    %cst_37 = arith.constant dense<0xFF800000> : vector<64xf32>
    %56 = vector.multi_reduction <maximumf>, %55, %cst_37 [1] : vector<64x64xf32> to vector<64xf32>
    %57 = vector.shape_cast %56 : vector<64xf32> to vector<64x1xf32>
    %58 = vector.broadcast %57 : vector<64x1xf32> to vector<64x64xf32>
    %59 = arith.subf %55, %58 : vector<64x64xf32>
    %60 = math.exp %59 : vector<64x64xf32>
    %cst_38 = arith.constant dense<0.000000e+00> : vector<64xf32>
    %61 = vector.multi_reduction <add>, %60, %cst_38 [1] : vector<64x64xf32> to vector<64xf32>
    %62 = vector.shape_cast %61 : vector<64xf32> to vector<64x1xf32>
    %63 = tpu.reciprocal %62 {approx = true} : vector<64x1xf32> -> vector<64x1xf32>
    %cst_39 = arith.constant 0.176776692 : f32
    %64 = vector.broadcast %cst_39 : f32 to vector<64x1xf32>
    %65 = arith.mulf %64, %63 : vector<64x1xf32>
    %66 = vector.broadcast %65 : vector<64x1xf32> to vector<64x64xf32>
    %67 = arith.mulf %60, %66 : vector<64x64xf32>
    %c0_40 = arith.constant 0 : index
    %c128 = arith.constant 128 : index
    %68 = vector.load %arg6[%c0_40, %c128] : memref<64x256xf32, #tpu.memory_space<vmem>>, vector<64x64xf32>
    tpu.vector_store %arg6[%c0_40, %c128], %67 {strides = array<i32>} : memref<64x256xf32, #tpu.memory_space<vmem>>, vector<64x64xf32>,
    %69 = arith.truncf %67 : vector<64x64xf32> to vector<64x64xbf16>
    %cst_41 = arith.constant dense<0.000000e+00> : vector<64x64xf32>
    %70 = tpu.matmul %69, %2, %cst_41 {dimension_numbers = #tpu.dot_dimension_numbers<[1], [0], [0], [1], [0, 0, 1, 1], [], []>} : vector<64x64xbf16>, vector<64x64xbf16>, vector<64x64xf32> -> vector<64x64xf32>
    %71 = arith.truncf %70 : vector<64x64xf32> to vector<64x64xbf16>
    %c2_42 = arith.constant 2 : index
    %c0_43 = arith.constant 0 : index
    %c0_44 = arith.constant 0 : index
    %72 = vector.load %arg5[%c2_42, %c0_43, %c0_44] : memref<4x64x64xbf16, #tpu.memory_space<vmem>>, vector<1x64x64xbf16>
    %73 = vector.shape_cast %72 : vector<1x64x64xbf16> to vector<64x64xbf16>
    %cst_45 = arith.constant dense<0.000000e+00> : vector<64x64xf32>
    %74 = tpu.matmul %71, %73, %cst_45 {dimension_numbers = #tpu.dot_dimension_numbers<[1], [0], [0], [1], [0, 0, 1, 1], [], []>} : vector<64x64xbf16>, vector<64x64xbf16>, vector<64x64xf32> -> vector<64x64xf32>
    %75 = arith.addf %51, %74 : vector<64x64xf32>
    %c3 = arith.constant 3 : index
    %c0_46 = arith.constant 0 : index
    %c0_47 = arith.constant 0 : index
    %76 = vector.load %arg3[%c3, %c0_46, %c0_47] : memref<4x16x16xf32, #tpu.memory_space<vmem>>, vector<1x16x16xf32>
    %77 = vector.shape_cast %76 : vector<1x16x16xf32> to vector<16x16xf32>
    %cst_48 = arith.constant dense<0.000000e+00> : vector<64x16xf32>
    %78 = tpu.matmul %0, %77, %cst_48 {dimension_numbers = #tpu.dot_dimension_numbers<[1], [0], [0], [1], [0, 0, 1, 1], [], []>} : vector<64x16xf32>, vector<16x16xf32>, vector<64x16xf32> -> vector<64x16xf32>
    %cst_49 = arith.constant dense<0.000000e+00> : vector<64x64xf32>
    %79 = tpu.matmul %78, %1, %cst_49 {dimension_numbers = #tpu.dot_dimension_numbers<[1], [0], [0], [1], [0, 0, 1, 1], [], []>} : vector<64x16xf32>, vector<16x64xf32>, vector<64x64xf32> -> vector<64x64xf32>
    %cst_50 = arith.constant dense<0xFF800000> : vector<64xf32>
    %80 = vector.multi_reduction <maximumf>, %79, %cst_50 [1] : vector<64x64xf32> to vector<64xf32>
    %81 = vector.shape_cast %80 : vector<64xf32> to vector<64x1xf32>
    %82 = vector.broadcast %81 : vector<64x1xf32> to vector<64x64xf32>
    %83 = arith.subf %79, %82 : vector<64x64xf32>
    %84 = math.exp %83 : vector<64x64xf32>
    %cst_51 = arith.constant dense<0.000000e+00> : vector<64xf32>
    %85 = vector.multi_reduction <add>, %84, %cst_51 [1] : vector<64x64xf32> to vector<64xf32>
    %86 = vector.shape_cast %85 : vector<64xf32> to vector<64x1xf32>
    %87 = tpu.reciprocal %86 {approx = true} : vector<64x1xf32> -> vector<64x1xf32>
    %cst_52 = arith.constant 0.176776692 : f32
    %88 = vector.broadcast %cst_52 : f32 to vector<64x1xf32>
    %89 = arith.mulf %88, %87 : vector<64x1xf32>
    %90 = vector.broadcast %89 : vector<64x1xf32> to vector<64x64xf32>
    %91 = arith.mulf %84, %90 : vector<64x64xf32>
    %c0_53 = arith.constant 0 : index
    %c192 = arith.constant 192 : index
    %92 = vector.load %arg6[%c0_53, %c192] : memref<64x256xf32, #tpu.memory_space<vmem>>, vector<64x64xf32>
    tpu.vector_store %arg6[%c0_53, %c192], %91 {strides = array<i32>} : memref<64x256xf32, #tpu.memory_space<vmem>>, vector<64x64xf32>,
    %93 = arith.truncf %91 : vector<64x64xf32> to vector<64x64xbf16>
    %cst_54 = arith.constant dense<0.000000e+00> : vector<64x64xf32>
    %94 = tpu.matmul %93, %2, %cst_54 {dimension_numbers = #tpu.dot_dimension_numbers<[1], [0], [0], [1], [0, 0, 1, 1], [], []>} : vector<64x64xbf16>, vector<64x64xbf16>, vector<64x64xf32> -> vector<64x64xf32>
    %95 = arith.truncf %94 : vector<64x64xf32> to vector<64x64xbf16>
    %c3_55 = arith.constant 3 : index
    %c0_56 = arith.constant 0 : index
    %c0_57 = arith.constant 0 : index
    %96 = vector.load %arg5[%c3_55, %c0_56, %c0_57] : memref<4x64x64xbf16, #tpu.memory_space<vmem>>, vector<1x64x64xbf16>
    %97 = vector.shape_cast %96 : vector<1x64x64xbf16> to vector<64x64xbf16>
    %cst_58 = arith.constant dense<0.000000e+00> : vector<64x64xf32>
    %98 = tpu.matmul %95, %97, %cst_58 {dimension_numbers = #tpu.dot_dimension_numbers<[1], [0], [0], [1], [0, 0, 1, 1], [], []>} : vector<64x64xbf16>, vector<64x64xbf16>, vector<64x64xf32> -> vector<64x64xf32>
    %99 = arith.addf %75, %98 : vector<64x64xf32>
    %c0_59 = arith.constant 0 : index
    %c0_60 = arith.constant 0 : index
    %100 = vector.load %arg7[%c0_59, %c0_60] : memref<64x64xf32, #tpu.memory_space<vmem>>, vector<64x64xf32>
    tpu.vector_store %arg7[%c0_59, %c0_60], %99 {strides = array<i32>} : memref<64x64xf32, #tpu.memory_space<vmem>>, vector<64x64xf32>,
    return
  }
  func.func @transform_0(%arg0: i32) -> (i32, i32) {
    %c0_i32 = arith.constant 0 : i32
    %c0_i32_0 = arith.constant 0 : i32
    %c0_i32_1 = arith.constant 0 : i32
    return %c0_i32, %c0_i32_0 : i32, i32
  }
  func.func @transform_1(%arg0: i32) -> (i32, i32) {
    %c0_i32 = arith.constant 0 : i32
    %c0_i32_0 = arith.constant 0 : i32
    %c0_i32_1 = arith.constant 0 : i32
    return %c0_i32, %c0_i32_0 : i32, i32
  }
  func.func @transform_2(%arg0: i32) -> (i32, i32, i32) {
    %c0_i32 = arith.constant 0 : i32
    %c0_i32_0 = arith.constant 0 : i32
    %c0_i32_1 = arith.constant 0 : i32
    %c0_i32_2 = arith.constant 0 : i32
    return %c0_i32, %c0_i32_0, %c0_i32_1 : i32, i32, i32
  }
  func.func @transform_3(%arg0: i32) -> (i32, i32) {
    %c0_i32 = arith.constant 0 : i32
    %c0_i32_0 = arith.constant 0 : i32
    %c0_i32_1 = arith.constant 0 : i32
    return %c0_i32, %c0_i32_0 : i32, i32
  }
  func.func @transform_4(%arg0: i32) -> (i32, i32, i32) {
    %c0_i32 = arith.constant 0 : i32
    %c0_i32_0 = arith.constant 0 : i32
    %c0_i32_1 = arith.constant 0 : i32
    %c0_i32_2 = arith.constant 0 : i32
    return %c0_i32, %c0_i32_0, %c0_i32_1 : i32, i32, i32
  }
  func.func @transform_5(%arg0: i32) -> (i32, i32) {
    %c0_i32 = arith.constant 0 : i32
    %c0_i32_0 = arith.constant 0 : i32
    %c0_i32_1 = arith.constant 0 : i32
    return %c0_i32, %c0_i32_0 : i32, i32
  }
  func.func @transform_6(%arg0: i32) -> (i32, i32) {
    %c0_i32 = arith.constant 0 : i32
    %c0_i32_0 = arith.constant 0 : i32
    %c0_i32_1 = arith.constant 0 : i32
    return %c0_i32, %c0_i32_0 : i32, i32
  }
}

</mosaic_0001>

<bundles_post_ra>
// kernel: tpu_custom_call.1
= control target key start
LH: loop header
LB: loop body
LE: loop exit
PB: predicated region body
PF: predicated region fallthrough
CT: control target
= control target key end

     0   :  { %12 = vsyncpa [#allocation3], 0  ;;  %s2744_s0 = inlined_call_operand.vmem [shape: f32[64,16], index: 0, kind: input, shape index: {}]   ;;  %s2745_s1 = inlined_call_operand.vmem [shape: f32[16,64], index: 1, kind: input, shape index: {}]   ;;  %s2746_s2 = inlined_call_operand.vmem [shape: f32[4,16,16], index: 2, kind: input, shape index: {}]   ;;  %s2747_s3 = inlined_call_operand.hbm [shape: bf16[64,64], index: 3, kind: input, shape index: {}]   ;;  %s2748_s4 = inlined_call_operand.hbm [shape: bf16[4,64,64], index: 4, kind: input, shape index: {}]   ;;  %s2749_s5 = inlined_call_operand.hbm [shape: f32[64,256], index: 5, kind: output, shape index: {0}]   ;;  %s2750_s6 = inlined_call_operand.hbm [shape: f32[64,64], index: 6, kind: output, shape index: {1}]  }
   0x1   :  { %13 = vsyncpa [#allocation6], 0 }
   0x2   :  { %14 = vsyncpa [#allocation4], 0 }
   0x3   :  { %15 = vsyncpa [#allocation9], 0  ;;  %s26_s23 = sshll.u32 %s2747_s3, 4  ;;  %s2038_s24 = smov [#allocation2]   ;;  %s27_s23 = int_to_ptr.hbm [resolvable:$true] %s26_s23 }
   0x4   :  { %s28_s25 = sshll.u32 %s2038_s24, 4  ;;  %s39_s28 = sshll.u32 %s2748_s4, 4  ;;  %s29_s25 = int_to_ptr.vmem [resolvable:$true] %s28_s25  ;;  %s40_s28 = int_to_ptr.hbm [resolvable:$true] %s39_s28 }
   0x5   :  { %s2039_s29 = smov 64   ;;  %s2040_s30 = smov 4  }
   0x6   :  { %34 = dma.hbm_to_vmem [thread:$0]  %s27_s23, 512, %s29_s25, [#allocation3], %s2039_s29, %s2039_s29, %s2040_s30  }
   0x7   :  { %s2041_s7 = smov [#allocation5]  }
   0x8   :  { %s41_s8 = sshll.u32 %s2041_s7, 4  ;;  %s42_s8 = int_to_ptr.vmem [resolvable:$true] %s41_s8 }
   0x9   :  { %47 = dma.hbm_to_vmem [thread:$0]  %s40_s28, 2048, %s42_s8, [#allocation6], %s2039_s29, %s2039_s29, %s2040_s30  }
   0xa   :  { %2030 = dma.done.wait [#allocation3], 512  }
   0xb   :  { %2031 = vsyncadd [#allocation3], 4294966784 }
   0xc   :  { %2032 = dma.done.wait [#allocation6], 2048  }
   0xd   :  { %2033 = vsyncadd [#allocation6], 4294965248  ;;  %v1631_v0 = vld [vmem:[%s2746_s2 + $0x18] sm:$0xff]  ;;  %v1630_v1 = vld [vmem:[%s2746_s2 + $0x10] sm:$0xff]  ;;  %vm77_vm0 = vcmask 130048   ;;  %vm208_vm1 = vcmask 523264  }
   0xe   :  { %411 = vmatpush.msra.mxu3 %v1631_v0  ;;  %v2102_v2 = vld [vmem:[%s2744_s0] sm:$0xff]  ;;  %v2109_v3 = vld [vmem:[%s2744_s0 + $0x8] sm:$0xff]  ;;  %v2116_v4 = vld [vmem:[%s2744_s0 + $0x10] sm:$0xff]  ;;  %vm631_vm2 = vcmask 1048064   ;;  %s1562_s18 = sshll.u32 %s2749_s5, 4  ;;  %s2043_s19 = smov 256   ;;  %s1563_s18 = int_to_ptr.hbm [resolvable:$true] %s1562_s18 }
   0xf   :  { %v2123_v5 = vld [vmem:[%s2744_s0 + $0x18] sm:$0xff]  ;;  %v76_v6 = vld [vmem:[%s2746_s2 + $0x8] sm:$0xff]  ;;  %v75_v7 = vld [vmem:[%s2746_s2] sm:$0xff]  ;;  %s2044_s20 = smov 16   ;;  %s2045_s5 = smov [#allocation8]  }
  0x10   :  { %412 = vmatpush.msra.mxu3 %v1630_v1  ;;  %v2136_v8 = vld [vmem:[%s2745_s1 + $0x8] sm:$0xff]  ;;  %116 = vmatpush.msra.mxu0 %v76_v6  ;;  %v2144_v9 = vld [vmem:[%s2745_s1] sm:$0xff]  ;;  %v2170_v12 = vld [vmem:[%s2744_s0 + $0x30] sm:$0xff]  ;;  %s1573_s21 = sshll.u32 %s2045_s5, 4  ;;  %s1575_s24 = sshll.u32 %s2750_s6, 4  ;;  %s1574_s21 = int_to_ptr.vmem [resolvable:$true] %s1573_s21  ;;  %s1576_s24 = int_to_ptr.hbm [resolvable:$true] %s1575_s24 }
  0x11   :  { %1632 = vmatmul.msk.f32.vlgmr.msra.gmra.mxu3 %vm77_vm0, %v2102_v2  ;;  %181 = vmatpush.msra.mxu1 %v2136_v8  ;;  %v2149_v10 = vld [vmem:[%s2744_s0 + $0x20] sm:$0xff]  ;;  %v2161_v11 = vld [vmem:[%s2744_s0 + $0x28] sm:$0xff]  ;;  %v2179_v13 = vld [vmem:[%s2744_s0 + $0x38] sm:$0xff]  ;;  %s2046_s25 = smov 128   ;;  %s2047_s26 = smov 8  }
  0x12   :  { %117 = vmatpush.msra.mxu0 %v75_v7  ;;  %v1693_v46 = vld [vmem:[%s2746_s2 + $0x28] sm:$0xff]  ;;  %v1692_v62 = vld [vmem:[%s2746_s2 + $0x20] sm:$0xff] }
  0x13   :  { %1594 = vmatmul.msk.f32.vlgmr.msra.gmra.mxu0 %vm77_vm0, %v2102_v2  ;;  %182 = vmatpush.msra.mxu1 %v2144_v9 }
  0x14   :  { %476 = vmatpush.msrb.mxu0 %v2136_v8 }
  0x16   :  { %477 = vmatpush.msrb.mxu0 %v2144_v9 }
  0x18   :  { %845 = vmatpush.msra.mxu0 %v1693_v46 }
  0x19   :  { %1633 = vmatmul.msk.f32.gmra.mxu3 %vm77_vm0, %v2109_v3 }
  0x1a   :  { %846 = vmatpush.msra.mxu0 %v1692_v62 }
  0x1b   :  { %1595 = vmatmul.msk.f32.gmra.mxu0 %vm77_vm0, %v2109_v3 }
  0x21   :  { %1634 = vmatmul.msk.f32.gmra.mxu3 %vm77_vm0, %v2116_v4 }
  0x23   :  { %1596 = vmatmul.msk.f32.gmra.mxu0 %vm77_vm0, %v2116_v4 }
  0x29   :  { %1635 = vmatmul.msk.f32.gmra.mxu3 %vm77_vm0, %v2123_v5 }
  0x2b   :  { %1597 = vmatmul.msk.f32.gmra.mxu0 %vm77_vm0, %v2123_v5 }
  0x31   :  { %1636 = vmatmul.msk.f32.gmra.mxu3 %vm77_vm0, %v2149_v10 }
  0x33   :  { %1598 = vmatmul.msk.f32.gmra.mxu0 %vm77_vm0, %v2149_v10 }
  0x39   :  { %1637 = vmatmul.msk.f32.gmra.mxu3 %vm77_vm0, %v2161_v11 }
  0x3b   :  { %1599 = vmatmul.msk.f32.gmra.mxu0 %vm77_vm0, %v2161_v11 }
  0x41   :  { %1638 = vmatmul.msk.f32.gmra.mxu3 %vm77_vm0, %v2170_v12 }
  0x43   :  { %1600 = vmatmul.msk.f32.gmra.mxu0 %vm77_vm0, %v2170_v12 }
  0x49   :  { %1639 = vmatmul.msk.f32.gmra.mxu3 %vm77_vm0, %v2179_v13 }
  0x4b   :  { %1601 = vmatmul.msk.f32.gmra.mxu0 %vm77_vm0, %v2179_v13 }
  0x90   :  { %v119_v18 = vpop.f32.mrf.mxu0 }
  0x91   :  { %1602 = vmatmul.msk.f32.vlgmr.msra.gmra.mxu1 %vm77_vm0, %v119_v18 }
  0x94   :  { %v414_v14 = vpop.f32.mrf.mxu3 }
  0x95   :  { %1640 = vmatmul.msk.f32.vlgmr.msrb.gmra.mxu0 %vm77_vm0, %v414_v14 }
  0x98   :  { %v122_v20 = vpop.f32.mrf.mxu0 }
  0x99   :  { %1603 = vmatmul.msk.f32.gmra.mxu1 %vm77_vm0, %v122_v20 }
  0x9c   :  { %v417_v15 = vpop.f32.mrf.mxu3 }
  0x9d   :  { %1641 = vmatmul.msk.f32.gmra.mxu0 %vm77_vm0, %v417_v15 }
  0xa0   :  { %v125_v22 = vpop.f32.mrf.mxu0 }
  0xa1   :  { %1604 = vmatmul.msk.f32.gmra.mxu1 %vm77_vm0, %v125_v22 }
  0xa4   :  { %v420_v16 = vpop.f32.mrf.mxu3 }
  0xa5   :  { %1642 = vmatmul.msk.f32.gmra.mxu0 %vm77_vm0, %v420_v16 }
  0xa8   :  { %v128_v24 = vpop.f32.mrf.mxu0 }
  0xa9   :  { %1605 = vmatmul.msk.f32.gmra.mxu1 %vm77_vm0, %v128_v24 }
  0xac   :  { %v423_v17 = vpop.f32.mrf.mxu3 }
  0xad   :  { %1643 = vmatmul.msk.f32.gmra.mxu0 %vm77_vm0, %v423_v17 }
  0xb0   :  { %v131_v26 = vpop.f32.mrf.mxu0 }
  0xb1   :  { %1606 = vmatmul.msk.f32.gmra.mxu1 %vm77_vm0, %v131_v26 }
  0xb4   :  { %v426_v19 = vpop.f32.mrf.mxu3 }
  0xb5   :  { %1644 = vmatmul.msk.f32.gmra.mxu0 %vm77_vm0, %v426_v19 }
  0xb8   :  { %v134_v27 = vpop.f32.mrf.mxu0 }
  0xb9   :  { %1607 = vmatmul.msk.f32.gmra.mxu1 %vm77_vm0, %v134_v27 }
  0xbc   :  { %v429_v21 = vpop.f32.mrf.mxu3 }
  0xbd   :  { %1645 = vmatmul.msk.f32.gmra.mxu0 %vm77_vm0, %v429_v21 }
  0xc0   :  { %v137_v28 = vpop.f32.mrf.mxu0 }
  0xc1   :  { %1608 = vmatmul.msk.f32.gmra.mxu1 %vm77_vm0, %v137_v28 }
  0xc4   :  { %v432_v23 = vpop.f32.mrf.mxu3 }
  0xc5   :  { %1646 = vmatmul.msk.f32.gmra.mxu0 %vm77_vm0, %v432_v23 }
  0xc8   :  { %v140_v29 = vpop.f32.mrf.mxu0 }
  0xc9   :  { %1609 = vmatmul.msk.f32.gmra.mxu1 %vm77_vm0, %v140_v29 }
  0xcc   :  { %v435_v25 = vpop.f32.mrf.mxu3 }
  0xcd   :  { %1647 = vmatmul.msk.f32.gmra.mxu0 %vm77_vm0, %v435_v25 }
  0xd5   :  { %1694 = vmatmul.msk.f32.vlgmr.msra.gmra.mxu0 %vm77_vm0, %v2102_v2 }
  0xdd   :  { %1695 = vmatmul.msk.f32.gmra.mxu0 %vm77_vm0, %v2109_v3 }
  0xe5   :  { %1696 = vmatmul.msk.f32.gmra.mxu0 %vm77_vm0, %v2116_v4 }
  0xed   :  { %1697 = vmatmul.msk.f32.gmra.mxu0 %vm77_vm0, %v2123_v5 }
  0xf5   :  { %1698 = vmatmul.msk.f32.gmra.mxu0 %vm77_vm0, %v2149_v10 }
  0xfd   :  { %1699 = vmatmul.msk.f32.gmra.mxu0 %vm77_vm0, %v2161_v11 }
 0x105   :  { %1700 = vmatmul.msk.f32.gmra.mxu0 %vm77_vm0, %v2170_v12 }
 0x10d   :  { %1701 = vmatmul.msk.f32.gmra.mxu0 %vm77_vm0, %v2179_v13 }
 0x10e   :  { %v2223_v53 = vpop.f32.mrf.mxu1 }
 0x112   :  { %v479_v30 = vpop.f32.mrf.mxu0 }
 0x113   :  { %v503_v31 = vsel %vm208_vm1, %v479_v30, -inf }
 0x114   :  { %504 = vmax.xlane.f32.xlu0 %v503_v31 }
 0x116   :  { %v2231_v61 = vpop.f32.mrf.mxu1 }
 0x11a   :  { %v482_v32 = vpop.f32.mrf.mxu0 }
 0x11b   :  { %v506_v33 = vsel %vm208_vm1, %v482_v32, -inf }
 0x11c   :  { %507 = vmax.xlane.f32.xlu0 %v506_v33 }
 0x11e   :  { %v2242_v14 = vpop.f32.mrf.mxu1 }
 0x122   :  { %v485_v34 = vpop.f32.mrf.mxu0 }
 0x123   :  { %v509_v35 = vsel %vm208_vm1, %v485_v34, -inf }
 0x124   :  { %510 = vmax.xlane.f32.xlu1 %v509_v35 }
 0x126   :  { %v2252_v21 = vpop.f32.mrf.mxu1 }
 0x12a   :  { %v488_v36 = vpop.f32.mrf.mxu0 }
 0x12b   :  { %v512_v37 = vsel %vm208_vm1, %v488_v36, -inf }
 0x12c   :  { %513 = vmax.xlane.f32.xlu1 %v512_v37 }
 0x12e   :  { %v2262_v29 = vpop.f32.mrf.mxu1 }
 0x132   :  { %v491_v38 = vpop.f32.mrf.mxu0 }
 0x133   :  { %v515_v39 = vsel %vm208_vm1, %v491_v38, -inf }
 0x134   :  { %516 = vmax.xlane.f32.xlu2 %v515_v39  ;;  %v209_v39 = vsel %vm208_vm1, %v2223_v53, -inf }
 0x13a   :  { %v494_v40 = vpop.f32.mrf.mxu0 }
 0x13b   :  { %v518_v41 = vsel %vm208_vm1, %v494_v40, -inf }
 0x13c   :  { %519 = vmax.xlane.f32.xlu2 %v518_v41  ;;  %v2285_v41 = vpop.f32.mrf.mxu1 }
 0x142   :  { %v497_v42 = vpop.f32.mrf.mxu0 }
 0x143   :  { %v521_v43 = vsel %vm208_vm1, %v497_v42, -inf }
 0x144   :  { %522 = vmax.xlane.f32.xlu0 %v521_v43  ;;  %v212_v43 = vsel %vm208_vm1, %v2231_v61, -inf  ;;  %v2299_v46 = vpop.f32.mrf.mxu1 }
 0x14a   :  { %v2214_v44 = vpop.f32.mrf.mxu0 }
 0x14b   :  { %v524_v45 = vsel %vm208_vm1, %v2214_v44, -inf }
 0x14c   :  { %525 = vmax.xlane.f32.xlu1 %v524_v45 }
 0x187   :  { %v505_v47 = vpop.xlane.xlu0 %504 }
 0x188   :  { %v527_v48 = vsub.f32 %v479_v30, %v505_v47  ;;  %v221_v47 = vsel %vm208_vm1, %v2262_v29, -inf }
 0x18a   :  { %v535_v49 = vmul.f32 1.442695, %v527_v48  ;;  %v227_v48 = vsel %vm208_vm1, %v2299_v46, -inf }
 0x18c   :  { %1806 = vpow2.f32 %v535_v49  ;;  %v215_v49 = vsel %vm208_vm1, %v2242_v14, -inf }
 0x18f   :  { %v508_v50 = vpop.xlane.xlu0 %507 }
 0x190   :  { %v528_v51 = vsub.f32 %v482_v32, %v508_v50  ;;  %v2266_v32 = vld [vmem:[#allocation2 + $0x18] sm:$0xff]  ;;  %v2311_v50 = vpop.f32.mrf.mxu1 }
 0x191   :  { %660 = vmatpush.bf16.msrb.mxu1 %v2266_v32  ;;  %357 = vmatpush.bf16.msra.mxu2 %v2266_v32 }
 0x192   :  { %v2221_v52 = vpop.eup %1806  ;;  %v537_v54 = vmul.f32 1.442695, %v528_v51  ;;  %v230_v51 = vsel %vm208_vm1, %v2311_v50, -inf }
 0x193   :  { %v551_v55 = vsel %vm208_vm1, %v2221_v52, 0.0 }
 0x194   :  { %1808 = vpow2.f32 %v537_v54  ;;  %552 = vadd.xlane.f32.xlu2 %v551_v55  ;;  %v224_v54 = vsel %vm208_vm1, %v2285_v41, -inf  ;;  %v2317_v55 = vld [vmem:[#allocation2] sm:$0xff] }
 0x197   :  { %v511_v56 = vpop.xlane.xlu1 %510 }
 0x198   :  { %v529_v57 = vsub.f32 %v485_v34, %v511_v56  ;;  %v2271_v34 = vld [vmem:[#allocation2 + $0x10] sm:$0xff]  ;;  %v1735_v56 = vld [vmem:[%s2746_s2 + $0x38] sm:$0xff] }
 0x199   :  { %661 = vmatpush.bf16.msrb.mxu1 %v2271_v34  ;;  %358 = vmatpush.bf16.msra.mxu2 %v2271_v34 }
 0x19a   :  { %v2227_v58 = vpop.eup %1808  ;;  %v539_v59 = vmul.f32 1.442695, %v529_v57  ;;  %1189 = vmatpush.msrb.mxu0 %v1735_v56  ;;  %v1734_v57 = vld [vmem:[%s2746_s2 + $0x30] sm:$0xff]  ;;  %s2042_s2 = smov [#allocation7]  }
 0x19b   :  { %v554_v60 = vsel %vm208_vm1, %v2227_v58, 0.0 }
 0x19c   :  { %1810 = vpow2.f32 %v539_v59  ;;  %555 = vadd.xlane.f32.xlu0 %v554_v60  ;;  %1190 = vmatpush.msrb.mxu0 %v1734_v57 }
 0x19d   :  { %1736 = vmatmul.msk.f32.vlgmr.msrb.gmra.mxu0 %vm77_vm0, %v2102_v2 }
 0x19f   :  { %v514_v63 = vpop.xlane.xlu1 %513 }
 0x1a0   :  { %v530_v0 = vsub.f32 %v488_v36, %v514_v63 }
 0x1a2   :  { %v2238_v1 = vpop.eup %1810  ;;  %v541_v6 = vmul.f32 1.442695, %v530_v0 }
 0x1a3   :  { %v557_v7 = vsel %vm208_vm1, %v2238_v1, 0.0 }
 0x1a4   :  { %1812 = vpow2.f32 %v541_v6  ;;  %558 = vadd.xlane.f32.xlu1 %v557_v7 }
 0x1a5   :  { %1737 = vmatmul.msk.f32.gmra.mxu0 %vm77_vm0, %v2109_v3 }
 0x1a7   :  { %v517_v15 = vpop.xlane.xlu2 %516 }
 0x1a8   :  { %v531_v16 = vsub.f32 %v491_v38, %v517_v15 }
 0x1aa   :  { %v2246_v17 = vpop.eup %1812  ;;  %v543_v18 = vmul.f32 1.442695, %v531_v16 }
 0x1ab   :  { %v560_v19 = vsel %vm208_vm1, %v2246_v17, 0.0 }
 0x1ac   :  { %1814 = vpow2.f32 %v543_v18  ;;  %561 = vadd.xlane.f32.xlu2 %v560_v19 }
 0x1ad   :  { %1738 = vmatmul.msk.f32.gmra.mxu0 %vm77_vm0, %v2116_v4 }
 0x1af   :  { %v520_v20 = vpop.xlane.xlu2 %519 }
 0x1b0   :  { %v532_v22 = vsub.f32 %v494_v40, %v520_v20  ;;  %v2282_v40 = vld [vmem:[#allocation2 + $0x8] sm:$0xff] }
 0x1b1   :  { %662 = vmatpush.bf16.msrb.mxu1 %v2282_v40  ;;  %359 = vmatpush.bf16.msra.mxu2 %v2282_v40 }
 0x1b2   :  { %v2254_v23 = vpop.eup %1814  ;;  %v545_v24 = vmul.f32 1.442695, %v532_v22 }
 0x1b3   :  { %v563_v25 = vsel %vm208_vm1, %v2254_v23, 0.0 }
 0x1b4   :  { %1816 = vpow2.f32 %v545_v24  ;;  %564 = vadd.xlane.f32.xlu0 %v563_v25 }
 0x1b5   :  { %663 = vmatpush.bf16.msrb.mxu1 %v2317_v55  ;;  %360 = vmatpush.bf16.msra.mxu2 %v2317_v55 }
 0x1b6   :  { %1739 = vmatmul.msk.f32.gmra.mxu0 %vm77_vm0, %v2123_v5 }
 0x1b7   :  { %v523_v26 = vpop.xlane.xlu0 %522 }
 0x1b8   :  { %v533_v27 = vsub.f32 %v497_v42, %v523_v26 }
 0x1b9   :  { %910 = vmatpush.msra.mxu1 %v2136_v8 }
 0x1ba   :  { %v2260_v28 = vpop.eup %1816  ;;  %v547_v30 = vmul.f32 1.442695, %v533_v27 }
 0x1bb   :  { %v566_v31 = vsel %vm208_vm1, %v2260_v28, 0.0  ;;  %911 = vmatpush.msra.mxu1 %v2144_v9 }
 0x1bc   :  { %1818 = vpow2.f32 %v547_v30  ;;  %567 = vadd.xlane.f32.xlu1 %v566_v31 }
 0x1be   :  { %1740 = vmatmul.msk.f32.gmra.mxu0 %vm77_vm0, %v2149_v10 }
 0x1bf   :  { %v526_v33 = vpop.xlane.xlu1 %525 }
 0x1c0   :  { %v534_v35 = vsub.f32 %v2214_v44, %v526_v33  ;;  %v218_v44 = vsel %vm208_vm1, %v2252_v21, -inf }
 0x1c2   :  { %v2275_v36 = vpop.eup %1818  ;;  %v549_v37 = vmul.f32 1.442695, %v534_v35 }
 0x1c3   :  { %v569_v38 = vsel %vm208_vm1, %v2275_v36, 0.0 }
 0x1c4   :  { %1820 = vpow2.f32 %v549_v37  ;;  %570 = vadd.xlane.f32.xlu2 %v569_v38  ;;  %210 = vmax.xlane.f32.xlu1 %v209_v39 }
 0x1c6   :  { %1741 = vmatmul.msk.f32.gmra.mxu0 %vm77_vm0, %v2161_v11 }
 0x1ca   :  { %v2291_v42 = vpop.eup %1820 }
 0x1cb   :  { %v572_v45 = vsel %vm208_vm1, %v2291_v42, 0.0 }
 0x1cc   :  { %213 = vmax.xlane.f32.xlu2 %v212_v43  ;;  %219 = vmax.xlane.f32.xlu1 %v218_v44 }
 0x1cd   :  { %573 = vadd.xlane.f32.xlu0 %v572_v45 }
 0x1ce   :  { %1742 = vmatmul.msk.f32.gmra.mxu0 %vm77_vm0, %v2170_v12 }
 0x1d4   :  { %222 = vmax.xlane.f32.xlu2 %v221_v47  ;;  %228 = vmax.xlane.f32.xlu1 %v227_v48 }
 0x1d5   :  { %216 = vmax.xlane.f32.xlu0 %v215_v49 }
 0x1d6   :  { %1743 = vmatmul.msk.f32.gmra.mxu0 %vm77_vm0, %v2179_v13 }
 0x1dc   :  { %231 = vmax.xlane.f32.xlu2 %v230_v51  ;;  %v848_v51 = vpop.f32.mrf.mxu0 }
 0x1dd   :  { %225 = vmax.xlane.f32.xlu0 %v224_v54 }
 0x207   :  { %v553_v59 = vpop.xlane.xlu2 %552 }
 0x208   :  { %1822 = vrcp.f32 %v553_v59 }
 0x20e   :  { %v1823_v62 = vpop.eup %1822 }
 0x20f   :  { %v556_v60 = vpop.xlane.xlu0 %555  ;;  %v583_v63 = vmul.f32 0.17677669, %v1823_v62  ;;  %v1786_v62 = vld [vmem:[#allocation5 + $0x30] sm:$0xff] }
 0x210   :  { %1824 = vrcp.f32 %v556_v60  ;;  %v1787_v60 = vld [vmem:[#allocation5 + $0x38] sm:$0xff] }
 0x211   :  { %v2338_v7 = vmul.f32 %v2221_v52, %v583_v63  ;;  %738 = vmatpush.bf16.msrb.mxu3 %v1787_v60 }
 0x215   :  { %739 = vmatpush.bf16.msrb.mxu3 %v1786_v62 }
 0x216   :  { %v1825_v0 = vpop.eup %1824 }
 0x217   :  { %v584_v6 = vmul.f32 0.17677669, %v1825_v0  ;;  %v559_v3 = vpop.xlane.xlu1 %558  ;;  %v1785_v0 = vld [vmem:[#allocation5 + $0x28] sm:$0xff] }
 0x218   :  { %1826 = vrcp.f32 %v559_v3 }
 0x219   :  { %v2341_v2 = vmul.f32 %v2227_v58, %v584_v6  ;;  %740 = vmatpush.bf16.msrb.mxu3 %v1785_v0  ;;  %v1784_v6 = vld [vmem:[#allocation5 + $0x20] sm:$0xff] }
 0x21b   :  { %v640_v15 = vpack.c.bf16 %v2341_v2, %v2338_v7 }
 0x21d   :  { %1648 = vmatmul.msk.bf16.vlgmr.msrb.gmra.mxu1 %vm208_vm1, %v640_v15  ;;  %741 = vmatpush.bf16.msrb.mxu3 %v1784_v6 }
 0x21e   :  { %1254 = vmatpush.msrb.mxu1 %v2136_v8  ;;  %v1827_v5 = vpop.eup %1826 }
 0x21f   :  { %v562_v4 = vpop.xlane.xlu2 %561  ;;  %v585_v52 = vmul.f32 0.17677669, %v1827_v5 }
 0x220   :  { %1828 = vrcp.f32 %v562_v4  ;;  %1255 = vmatpush.msrb.mxu1 %v2144_v9 }
 0x221   :  { %v2353_v18 = vmul.f32 %v2238_v1, %v585_v52  ;;  %1061 = vmatpush.bf16.msra.mxu3 %v2266_v32 }
 0x225   :  { %1062 = vmatpush.bf16.msra.mxu3 %v2271_v34 }
 0x226   :  { %v1829_v58 = vpop.eup %1828 }
 0x227   :  { %v586_v16 = vmul.f32 0.17677669, %v1829_v58  ;;  %v565_v8 = vpop.xlane.xlu0 %564 }
 0x228   :  { %1830 = vrcp.f32 %v565_v8 }
 0x229   :  { %v2356_v19 = vmul.f32 %v2246_v17, %v586_v16  ;;  %1063 = vmatpush.bf16.msra.mxu3 %v2282_v40 }
 0x22b   :  { %v641_v20 = vpack.c.bf16 %v2356_v19, %v2353_v18 }
 0x22d   :  { %1649 = vmatmul.msk.bf16.gmra.mxu1 %vm208_vm1, %v641_v20  ;;  %1064 = vmatpush.bf16.msra.mxu3 %v2317_v55 }
 0x22e   :  { %v1831_v10 = vpop.eup %1830 }
 0x22f   :  { %v568_v9 = vpop.xlane.xlu1 %567  ;;  %v587_v11 = vmul.f32 0.17677669, %v1831_v10 }
 0x230   :  { %1832 = vrcp.f32 %v568_v9 }
 0x231   :  { %v2367_v26 = vmul.f32 %v2254_v23, %v587_v11 }
 0x236   :  { %v1833_v22 = vpop.eup %1832 }
 0x237   :  { %v588_v1 = vmul.f32 0.17677669, %v1833_v22  ;;  %v571_v24 = vpop.xlane.xlu2 %570  ;;  %v211_v25 = vpop.xlane.xlu1 %210 }
 0x238   :  { %v233_v17 = vsub.f32 %v2223_v53, %v211_v25 }
 0x239   :  { %v2370_v27 = vmul.f32 %v2260_v28, %v588_v1 }
 0x23a   :  { %v241_v30 = vmul.f32 1.442695, %v233_v17 }
 0x23b   :  { %v642_v12 = vpack.c.bf16 %v2370_v27, %v2367_v26 }
 0x23c   :  { %1834 = vpow2.f32 %v241_v30 }
 0x23d   :  { %1836 = vrcp.f32 %v571_v24  ;;  %1650 = vmatmul.msk.bf16.gmra.mxu1 %vm208_vm1, %v642_v12 }
 0x23f   :  { %v214_v31 = vpop.xlane.xlu2 %213  ;;  %v220_v8 = vpop.xlane.xlu1 %219 }
 0x240   :  { %v234_v53 = vsub.f32 %v2231_v61, %v214_v31  ;;  %v574_v33 = vpop.xlane.xlu0 %573 }
 0x241   :  { %1838 = vrcp.f32 %v574_v33 }
 0x242   :  { %v2376_v13 = vpop.eup %1834  ;;  %v243_v23 = vmul.f32 1.442695, %v234_v53 }
 0x243   :  { %v1837_v35 = vpop.eup %1836  ;;  %v257_v28 = vsel %vm208_vm1, %v2376_v13, 0.0 }
 0x244   :  { %1840 = vpow2.f32 %v243_v23  ;;  %258 = vadd.xlane.f32.xlu0 %v257_v28  ;;  %v589_v37 = vmul.f32 0.17677669, %v1837_v35 }
 0x246   :  { %v2384_v61 = vmul.f32 %v2275_v36, %v589_v37 }
 0x247   :  { %v1839_v38 = vpop.eup %1838  ;;  %v2417_v11 = vpop.xlane.xlu1 %228 }
 0x248   :  { %v590_v39 = vmul.f32 0.17677669, %v1839_v38  ;;  %v217_v43 = vpop.xlane.xlu0 %216  ;;  %v236_v38 = vsub.f32 %v2252_v21, %v220_v8 }
 0x249   :  { %v235_v44 = vsub.f32 %v2242_v14, %v217_v43 }
 0x24a   :  { %v2381_v45 = vpop.eup %1840  ;;  %v2387_v47 = vmul.f32 %v2291_v42, %v590_v39  ;;  %v851_v42 = vpop.f32.mrf.mxu0 }
 0x24b   :  { %v245_v48 = vmul.f32 1.442695, %v235_v44  ;;  %v260_v49 = vsel %vm208_vm1, %v2381_v45, 0.0 }
 0x24c   :  { %261 = vadd.xlane.f32.xlu1 %v260_v49  ;;  %v643_v54 = vpack.c.bf16 %v2387_v47, %v2384_v61 }
 0x24d   :  { %1842 = vpow2.f32 %v245_v48  ;;  %v223_v48 = vpop.xlane.xlu2 %222 }
 0x24e   :  { %1651 = vmatmul.msk.bf16.gmra.mxu1 %vm208_vm1, %v643_v54  ;;  %v237_v49 = vsub.f32 %v2262_v29, %v223_v48 }
 0x250   :  { %v226_v20 = vpop.xlane.xlu0 %225 }
 0x252   :  { %v854_v56 = vpop.f32.mrf.mxu0 }
 0x253   :  { %v2394_v14 = vpop.eup %1842 }
 0x254   :  { %v263_v36 = vsel %vm208_vm1, %v2394_v14, 0.0 }
 0x255   :  { %264 = vadd.xlane.f32.xlu1 %v263_v36 }
 0x25a   :  { %v857_v57 = vpop.f32.mrf.mxu0 }
 0x25e   :  { %1702 = vmatmul.msk.f32.vlgmr.msra.gmra.mxu1 %vm77_vm0, %v848_v51 }
 0x262   :  { %v860_v59 = vpop.f32.mrf.mxu0 }
 0x266   :  { %1703 = vmatmul.msk.f32.gmra.mxu1 %vm77_vm0, %v851_v42  ;;  %v238_v42 = vsub.f32 %v2285_v41, %v226_v20 }
 0x268   :  { %v251_v60 = vmul.f32 1.442695, %v238_v42 }
 0x26a   :  { %v863_v63 = vpop.f32.mrf.mxu0 }
 0x26e   :  { %1704 = vmatmul.msk.f32.gmra.mxu1 %vm77_vm0, %v854_v56 }
 0x272   :  { %v866_v3 = vpop.f32.mrf.mxu0 }
 0x276   :  { %1705 = vmatmul.msk.f32.gmra.mxu1 %vm77_vm0, %v857_v57 }
 0x27a   :  { %v869_v15 = vpop.f32.mrf.mxu0 }
 0x27e   :  { %1706 = vmatmul.msk.f32.gmra.mxu1 %vm77_vm0, %v860_v59 }
 0x282   :  { %v1192_v5 = vpop.f32.mrf.mxu0 }
 0x286   :  { %1707 = vmatmul.msk.f32.gmra.mxu1 %vm77_vm0, %v863_v63  ;;  %v239_v63 = vsub.f32 %v2299_v46, %v2417_v11 }
 0x28a   :  { %v1195_v30 = vpop.f32.mrf.mxu0 }
 0x28e   :  { %1708 = vmatmul.msk.f32.gmra.mxu1 %vm77_vm0, %v866_v3 }
 0x296   :  { %1709 = vmatmul.msk.f32.gmra.mxu1 %vm77_vm0, %v869_v15  ;;  %v253_v15 = vmul.f32 1.442695, %v239_v63 }
 0x29a   :  { %v665_v4 = vpop.f32.mrf.mxu1 }
 0x29e   :  { %1744 = vmatmul.msk.f32.vlgmr.msrb.gmra.mxu1 %vm77_vm0, %v1192_v5 }
 0x2a2   :  { %v667_v52 = vpop.f32.mrf.mxu1 }
 0x2a3   :  { %v685_v58 = vpack.c.bf16 %v667_v52, %v665_v4  ;;  %v232_v4 = vpop.xlane.xlu2 %231 }
 0x2a4   :  { %v240_v46 = vsub.f32 %v2311_v50, %v232_v4 }
 0x2a5   :  { %1668 = vmatmul.msk.bf16.vlgmr.msrb.gmra.mxu3 %vm208_vm1, %v685_v58 }
 0x2a6   :  { %1437 = vmatpush.bf16.msrb.mxu3 %v2266_v32  ;;  %1745 = vmatmul.msk.f32.gmra.mxu1 %vm77_vm0, %v1195_v30  ;;  %v255_v20 = vmul.f32 1.442695, %v240_v46 }
 0x2aa   :  { %v670_v16 = vpop.f32.mrf.mxu1  ;;  %1438 = vmatpush.bf16.msrb.mxu3 %v2271_v34 }
 0x2ae   :  { %1439 = vmatpush.bf16.msrb.mxu3 %v2282_v40 }
 0x2b2   :  { %v672_v9 = vpop.f32.mrf.mxu1  ;;  %1440 = vmatpush.bf16.msrb.mxu3 %v2317_v55 }
 0x2b3   :  { %v686_v10 = vpack.c.bf16 %v672_v9, %v670_v16 }
 0x2b5   :  { %1669 = vmatmul.msk.bf16.gmra.mxu3 %vm208_vm1, %v686_v10 }
 0x2b7   :  { %v259_v22 = vpop.xlane.xlu0 %258 }
 0x2b8   :  { %1844 = vrcp.f32 %v259_v22 }
 0x2ba   :  { %v675_v1 = vpop.f32.mrf.mxu1 }
 0x2be   :  { %v1845_v24 = vpop.eup %1844 }
 0x2bf   :  { %v289_v32 = vmul.f32 0.17677669, %v1845_v24  ;;  %v262_v25 = vpop.xlane.xlu1 %261 }
 0x2c0   :  { %1846 = vrcp.f32 %v262_v25 }
 0x2c1   :  { %v297_v34 = vmul.f32 %v2376_v13, %v289_v32  ;;  %v1198_v13 = vpop.f32.mrf.mxu0 }
 0x2c2   :  { %v677_v17 = vpop.f32.mrf.mxu1  ;;  %1746 = vmatmul.msk.f32.gmra.mxu1 %vm77_vm0, %v1198_v13 }
 0x2c3   :  { %305 = vst.msk [vmem:[#allocation7] sm:$0xff] %vm208_vm1, %v297_v34  ;;  %v687_v40 = vpack.c.bf16 %v677_v17, %v675_v1 }
 0x2c5   :  { %1670 = vmatmul.msk.bf16.gmra.mxu3 %vm208_vm1, %v687_v40 }
 0x2c6   :  { %v1847_v55 = vpop.eup %1846 }
 0x2c7   :  { %v290_v12 = vmul.f32 0.17677669, %v1847_v55 }
 0x2c8   :  { %v265_v31 = vpop.xlane.xlu1 %264 }
 0x2c9   :  { %v298_v53 = vmul.f32 %v2381_v45, %v290_v12  ;;  %1848 = vrcp.f32 %v265_v31  ;;  %v1201_v43 = vpop.f32.mrf.mxu0  ;;  %v247_v45 = vmul.f32 1.442695, %v236_v38 }
 0x2ca   :  { %1747 = vmatmul.msk.f32.gmra.mxu1 %vm77_vm0, %v1201_v43 }
 0x2cb   :  { %306 = vst.msk [vmem:[#allocation7 + $0x10] sm:$0xff] %vm208_vm1, %v298_v53  ;;  %v680_v33 = vpop.f32.mrf.mxu1  ;;  %v313_v23 = vpack.c.bf16 %v298_v53, %v297_v34  ;;  %1850 = vpow2.f32 %v247_v45 }
 0x2cd   :  { %1626 = vmatmul.msk.bf16.vlgmr.msra.gmra.mxu2 %vm208_vm1, %v313_v23 }
 0x2cf   :  { %v1849_v35 = vpop.eup %1848 }
 0x2d0   :  { %v291_v28 = vmul.f32 0.17677669, %v1849_v35 }
 0x2d1   :  { %v1204_v54 = vpop.f32.mrf.mxu0  ;;  %v2441_v36 = vpop.eup %1850 }
 0x2d2   :  { %v2428_v37 = vmul.f32 %v2394_v14, %v291_v28  ;;  %1748 = vmatmul.msk.f32.gmra.mxu1 %vm77_vm0, %v1204_v54  ;;  %v249_v14 = vmul.f32 1.442695, %v237_v49  ;;  %v266_v59 = vsel %vm208_vm1, %v2441_v36, 0.0 }
 0x2d3   :  { %v682_v39 = vpop.f32.mrf.mxu1 }
 0x2d4   :  { %307 = vst.msk [vmem:[#allocation7 + $0x20] sm:$0xff] %vm208_vm1, %v2428_v37  ;;  %v688_v44 = vpack.c.bf16 %v682_v39, %v680_v33  ;;  %1852 = vpow2.f32 %v249_v14 }
 0x2d5   :  { %1854 = vpow2.f32 %v251_v60 }
 0x2d6   :  { %1671 = vmatmul.msk.bf16.gmra.mxu3 %vm208_vm1, %v688_v44  ;;  %1856 = vpow2.f32 %v253_v15 }
 0x2d7   :  { %1858 = vpow2.f32 %v255_v20 }
 0x2d9   :  { %v1207_v57 = vpop.f32.mrf.mxu0 }
 0x2da   :  { %1749 = vmatmul.msk.f32.gmra.mxu1 %vm77_vm0, %v1207_v57  ;;  %v2451_v62 = vpop.eup %1852 }
 0x2db   :  { %v2436_v51 = vpop.f32.mrf.mxu1  ;;  %v269_v3 = vsel %vm208_vm1, %v2451_v62, 0.0  ;;  %v2462_v5 = vpop.eup %1854 }
 0x2dc   :  { %v937_v21 = vsel %vm208_vm1, %v2436_v51, -inf  ;;  %v272_v16 = vsel %vm208_vm1, %v2462_v5, 0.0  ;;  %v2472_v9 = vpop.eup %1856 }
 0x2dd   :  { %938 = vmax.xlane.f32.xlu2 %v937_v21  ;;  %v275_v50 = vsel %vm208_vm1, %v2472_v9, 0.0  ;;  %v2480_v22 = vpop.eup %1858 }
 0x2de   :  { %v278_v32 = vsel %vm208_vm1, %v2480_v22, 0.0 }
 0x2e1   :  { %v1210_v0 = vpop.f32.mrf.mxu0 }
 0x2e2   :  { %1750 = vmatmul.msk.f32.gmra.mxu1 %vm77_vm0, %v1210_v0 }
 0x2e3   :  { %v2444_v56 = vpop.f32.mrf.mxu1 }
 0x2e4   :  { %v940_v29 = vsel %vm208_vm1, %v2444_v56, -inf }
 0x2e5   :  { %941 = vmax.xlane.f32.xlu0 %v940_v29  ;;  %267 = vadd.xlane.f32.xlu2 %v266_v59  ;;  %v1783_v29 = vld [vmem:[#allocation5 + $0x18] sm:$0xff] }
 0x2e6   :  { %803 = vmatpush.bf16.msrb.mxu2 %v1783_v29 }
 0x2e9   :  { %v1213_v58 = vpop.f32.mrf.mxu0 }
 0x2ea   :  { %1751 = vmatmul.msk.f32.gmra.mxu1 %vm77_vm0, %v1213_v58  ;;  %v1781_v58 = vld [vmem:[#allocation5 + $0x8] sm:$0xff] }
 0x2eb   :  { %v2455_v41 = vpop.f32.mrf.mxu1 }
 0x2ec   :  { %v943_v6 = vsel %vm208_vm1, %v2455_v41, -inf }
 0x2ed   :  { %944 = vmax.xlane.f32.xlu0 %v943_v6  ;;  %270 = vadd.xlane.f32.xlu2 %v269_v3  ;;  %v1782_v3 = vld [vmem:[#allocation5 + $0x10] sm:$0xff] }
 0x2ee   :  { %804 = vmatpush.bf16.msrb.mxu2 %v1782_v3 }
 0x2f2   :  { %805 = vmatpush.bf16.msrb.mxu2 %v1781_v58 }
 0x2f3   :  { %v2465_v52 = vpop.f32.mrf.mxu1 }
 0x2f4   :  { %v946_v8 = vsel %vm208_vm1, %v2465_v52, -inf }
 0x2f5   :  { %273 = vadd.xlane.f32.xlu0 %v272_v16  ;;  %947 = vmax.xlane.f32.xlu1 %v946_v8 }
 0x2fb   :  { %v2474_v10 = vpop.f32.mrf.mxu1 }
 0x2fc   :  { %v949_v11 = vsel %vm208_vm1, %v2474_v10, -inf }
 0x2fd   :  { %276 = vadd.xlane.f32.xlu0 %v275_v50  ;;  %950 = vmax.xlane.f32.xlu1 %v949_v11 }
 0x303   :  { %v2482_v1 = vpop.f32.mrf.mxu1 }
 0x304   :  { %v952_v24 = vsel %vm208_vm1, %v2482_v1, -inf }
 0x305   :  { %953 = vmax.xlane.f32.xlu2 %v952_v24  ;;  %279 = vadd.xlane.f32.xlu1 %v278_v32  ;;  %v1780_v32 = vld [vmem:[#allocation5] sm:$0xff] }
 0x306   :  { %806 = vmatpush.bf16.msrb.mxu2 %v1780_v32 }
 0x30b   :  { %v2488_v25 = vpop.f32.mrf.mxu1 }
 0x30c   :  { %v955_v34 = vsel %vm208_vm1, %v2488_v25, -inf }
 0x30d   :  { %956 = vmax.xlane.f32.xlu2 %v955_v34 }
 0x313   :  { %v2492_v17 = vpop.f32.mrf.mxu1 }
 0x314   :  { %v958_v40 = vsel %vm208_vm1, %v2492_v17, -inf }
 0x315   :  { %959 = vmax.xlane.f32.xlu0 %v958_v40 }
 0x31b   :  { %v2496_v30 = vpop.f32.mrf.mxu1 }
 0x31c   :  { %v1281_v55 = vsel %vm208_vm1, %v2496_v30, -inf }
 0x31d   :  { %1282 = vmax.xlane.f32.xlu0 %v1281_v55 }
 0x323   :  { %v2501_v33 = vpop.f32.mrf.mxu1 }
 0x324   :  { %v1284_v21 = vsel %vm208_vm1, %v2501_v33, -inf }
 0x33f   :  { %v2508_v43 = vpop.f32.mrf.mxu1 }
 0x347   :  { %v2521_v59 = vpop.f32.mrf.mxu1 }
 0x348   :  { %v1290_v24 = vsel %vm208_vm1, %v2521_v59, -inf }
 0x34f   :  { %v2533_v50 = vpop.f32.mrf.mxu1 }
 0x350   :  { %v939_v12 = vpop.xlane.xlu2 %938 }
 0x351   :  { %v961_v31 = vsub.f32 %v2436_v51, %v939_v12 }
 0x353   :  { %v969_v53 = vmul.f32 1.442695, %v961_v31 }
 0x355   :  { %1860 = vpow2.f32 %v969_v53 }
 0x358   :  { %v942_v23 = vpop.xlane.xlu0 %941  ;;  %v268_v13 = vpop.xlane.xlu2 %267 }
 0x359   :  { %v962_v35 = vsub.f32 %v2444_v56, %v942_v23  ;;  %1862 = vrcp.f32 %v268_v13 }
 0x35b   :  { %v2504_v28 = vpop.eup %1860  ;;  %v971_v38 = vmul.f32 1.442695, %v962_v35  ;;  %v1293_v35 = vsel %vm208_vm1, %v2533_v50, -inf }
 0x35c   :  { %v985_v39 = vsel %vm208_vm1, %v2504_v28, 0.0 }
 0x35d   :  { %1864 = vpow2.f32 %v971_v38  ;;  %986 = vadd.xlane.f32.xlu1 %v985_v39 }
 0x35f   :  { %v1863_v44 = vpop.eup %1862 }
 0x360   :  { %v292_v45 = vmul.f32 0.17677669, %v1863_v44  ;;  %v945_v48 = vpop.xlane.xlu0 %944  ;;  %v271_v49 = vpop.xlane.xlu2 %270 }
 0x361   :  { %v963_v51 = vsub.f32 %v2455_v41, %v945_v48  ;;  %1866 = vrcp.f32 %v271_v49  ;;  %v2550_v44 = vpop.f32.mrf.mxu1 }
 0x362   :  { %v300_v54 = vmul.f32 %v2441_v36, %v292_v45 }
 0x363   :  { %v2514_v14 = vpop.eup %1864  ;;  %v973_v42 = vmul.f32 1.442695, %v963_v51 }
 0x364   :  { %308 = vst.msk [vmem:[#allocation7 + $0x30] sm:$0xff] %vm208_vm1, %v300_v54  ;;  %v988_v56 = vsel %vm208_vm1, %v2514_v14, 0.0  ;;  %v314_v57 = vpack.c.bf16 %v300_v54, %v2428_v37  ;;  %v1287_v37 = vsel %vm208_vm1, %v2508_v43, -inf  ;;  %v1296_v54 = vsel %vm208_vm1, %v2550_v44, -inf }
 0x365   :  { %1868 = vpow2.f32 %v973_v42  ;;  %989 = vadd.xlane.f32.xlu2 %v988_v56  ;;  %1285 = vmax.xlane.f32.xlu1 %v1284_v21 }
 0x366   :  { %1627 = vmatmul.msk.bf16.gmra.mxu2 %vm208_vm1, %v314_v57 }
 0x367   :  { %v1867_v36 = vpop.eup %1866 }
 0x368   :  { %v293_v60 = vmul.f32 0.17677669, %v1867_v36  ;;  %v274_v63 = vpop.xlane.xlu0 %273  ;;  %v948_v41 = vpop.xlane.xlu1 %947 }
 0x369   :  { %1870 = vrcp.f32 %v274_v63  ;;  %v964_v0 = vsub.f32 %v2465_v52, %v948_v41  ;;  %v2564_v29 = vpop.f32.mrf.mxu1 }
 0x36a   :  { %v301_v6 = vmul.f32 %v2451_v62, %v293_v60  ;;  %v1299_v60 = vsel %vm208_vm1, %v2564_v29, -inf }
 0x36b   :  { %v2527_v15 = vpop.eup %1868  ;;  %v975_v4 = vmul.f32 1.442695, %v964_v0 }
 0x36c   :  { %309 = vst.msk [vmem:[#allocation7 + $0x40] sm:$0xff] %vm208_vm1, %v301_v6  ;;  %v991_v46 = vsel %vm208_vm1, %v2527_v15, 0.0 }
 0x36d   :  { %1872 = vpow2.f32 %v975_v4  ;;  %992 = vadd.xlane.f32.xlu2 %v991_v46  ;;  %1288 = vmax.xlane.f32.xlu1 %v1287_v37 }
 0x36f   :  { %v1871_v52 = vpop.eup %1870 }
 0x370   :  { %v294_v16 = vmul.f32 0.17677669, %v1871_v52  ;;  %v277_v62 = vpop.xlane.xlu0 %276  ;;  %v951_v8 = vpop.xlane.xlu1 %950 }
 0x371   :  { %1874 = vrcp.f32 %v277_v62  ;;  %v965_v20 = vsub.f32 %v2474_v10, %v951_v8 }
 0x372   :  { %v302_v11 = vmul.f32 %v2462_v5, %v294_v16 }
 0x373   :  { %v2538_v34 = vpop.eup %1872  ;;  %v977_v40 = vmul.f32 1.442695, %v965_v20 }
 0x374   :  { %310 = vst.msk [vmem:[#allocation7 + $0x50] sm:$0xff] %vm208_vm1, %v302_v11  ;;  %v994_v55 = vsel %vm208_vm1, %v2538_v34, 0.0  ;;  %v315_v12 = vpack.c.bf16 %v302_v11, %v301_v6  ;;  %v2574_v6 = vpop.f32.mrf.mxu1 }
 0x375   :  { %1876 = vpow2.f32 %v977_v40  ;;  %995 = vadd.xlane.f32.xlu0 %v994_v55  ;;  %1291 = vmax.xlane.f32.xlu2 %v1290_v24 }
 0x376   :  { %1628 = vmatmul.msk.bf16.gmra.mxu2 %vm208_vm1, %v315_v12 }
 0x377   :  { %v1875_v5 = vpop.eup %1874 }
 0x378   :  { %v295_v10 = vmul.f32 0.17677669, %v1875_v5  ;;  %v280_v31 = vpop.xlane.xlu1 %279  ;;  %v954_v53 = vpop.xlane.xlu2 %953 }
 0x379   :  { %1878 = vrcp.f32 %v280_v31  ;;  %v966_v23 = vsub.f32 %v2482_v1, %v954_v53 }
 0x37a   :  { %v303_v13 = vmul.f32 %v2472_v9, %v295_v10 }
 0x37b   :  { %v2548_v38 = vpop.eup %1876  ;;  %v979_v39 = vmul.f32 1.442695, %v966_v23 }
 0x37c   :  { %311 = vst.msk [vmem:[#allocation7 + $0x60] sm:$0xff] %vm208_vm1, %v303_v13  ;;  %v997_v45 = vsel %vm208_vm1, %v2548_v38, 0.0 }
 0x37d   :  { %1880 = vpow2.f32 %v979_v39  ;;  %998 = vadd.xlane.f32.xlu0 %v997_v45  ;;  %1294 = vmax.xlane.f32.xlu2 %v1293_v35 }
 0x37f   :  { %v1879_v48 = vpop.eup %1878 }
 0x380   :  { %v296_v1 = vmul.f32 0.17677669, %v1879_v48  ;;  %v957_v49 = vpop.xlane.xlu2 %956 }
 0x381   :  { %v967_v9 = vsub.f32 %v2488_v25, %v957_v49 }
 0x382   :  { %v304_v51 = vmul.f32 %v2480_v22, %v296_v1  ;;  %v362_v22 = vpop.f32.mrf.mxu2 }
 0x383   :  { %v2559_v21 = vpop.eup %1880  ;;  %v981_v42 = vmul.f32 1.442695, %v967_v9 }
 0x384   :  { %312 = vst.msk [vmem:[#allocation7 + $0x70] sm:$0xff] %vm208_vm1, %v304_v51  ;;  %v1000_v56 = vsel %vm208_vm1, %v2559_v21, 0.0  ;;  %v316_v57 = vpack.c.bf16 %v304_v51, %v303_v13 }
 0x385   :  { %1882 = vpow2.f32 %v981_v42  ;;  %1297 = vmax.xlane.f32.xlu0 %v1296_v54  ;;  %1001 = vadd.xlane.f32.xlu1 %v1000_v56 }
 0x386   :  { %1629 = vmatmul.msk.bf16.gmra.mxu2 %vm208_vm1, %v316_v57 }
 0x388   :  { %v960_v25 = vpop.xlane.xlu0 %959 }
 0x389   :  { %v968_v36 = vsub.f32 %v2492_v17, %v960_v25  ;;  %v1302_v17 = vsel %vm208_vm1, %v2574_v6, -inf }
 0x38a   :  { %v364_v3 = vpop.f32.mrf.mxu2 }
 0x38b   :  { %v2570_v63 = vpop.eup %1882  ;;  %v983_v41 = vmul.f32 1.442695, %v968_v36  ;;  %v382_v52 = vpack.c.bf16 %v364_v3, %v362_v22 }
 0x38c   :  { %v1003_v0 = vsel %vm208_vm1, %v2570_v63, 0.0 }
 0x38d   :  { %1884 = vpow2.f32 %v983_v41  ;;  %1300 = vmax.xlane.f32.xlu0 %v1299_v60  ;;  %1004 = vadd.xlane.f32.xlu1 %v1003_v0 }
 0x390   :  { %v1283_v37 = vpop.xlane.xlu0 %1282 }
 0x391   :  { %v1305_v4 = vsub.f32 %v2496_v30, %v1283_v37 }
 0x393   :  { %v2579_v46 = vpop.eup %1884  ;;  %v1313_v58 = vmul.f32 1.442695, %v1305_v4 }
 0x394   :  { %v1006_v16 = vsel %vm208_vm1, %v2579_v46, 0.0 }
 0x395   :  { %1886 = vpow2.f32 %v1313_v58  ;;  %1007 = vadd.xlane.f32.xlu2 %v1006_v16  ;;  %1303 = vmax.xlane.f32.xlu1 %v1302_v17 }
 0x396   :  { %1688 = vmatmul.msk.bf16.vlgmr.msrb.gmra.mxu2 %vm208_vm1, %v382_v52 }
 0x39b   :  { %v2584_v62 = vpop.eup %1886 }
 0x39c   :  { %v1329_v30 = vsel %vm208_vm1, %v2584_v62, 0.0 }
 0x39d   :  { %1330 = vadd.xlane.f32.xlu2 %v1329_v30 }
 0x3d0   :  { %v987_v8 = vpop.xlane.xlu1 %986 }
 0x3d1   :  { %1888 = vrcp.f32 %v987_v8 }
 0x3d7   :  { %v1889_v20 = vpop.eup %1888 }
 0x3d8   :  { %v1017_v11 = vmul.f32 0.17677669, %v1889_v20  ;;  %v1286_v24 = vpop.xlane.xlu1 %1285  ;;  %v990_v32 = vpop.xlane.xlu2 %989 }
 0x3d9   :  { %v1306_v40 = vsub.f32 %v2501_v33, %v1286_v24  ;;  %1890 = vrcp.f32 %v990_v32 }
 0x3da   :  { %v1025_v55 = vmul.f32 %v2504_v28, %v1017_v11 }
 0x3db   :  { %v1315_v12 = vmul.f32 1.442695, %v1306_v40 }
 0x3dc   :  { %1033 = vst.msk [vmem:[#allocation7 + $0x8] sm:$0xff] %vm208_vm1, %v1025_v55 }
 0x3dd   :  { %1892 = vpow2.f32 %v1315_v12 }
 0x3df   :  { %v1891_v5 = vpop.eup %1890 }
 0x3e0   :  { %v1018_v10 = vmul.f32 0.17677669, %v1891_v5  ;;  %v1289_v31 = vpop.xlane.xlu1 %1288  ;;  %v993_v53 = vpop.xlane.xlu2 %992 }
 0x3e1   :  { %v1307_v23 = vsub.f32 %v2508_v43, %v1289_v31  ;;  %1894 = vrcp.f32 %v993_v53 }
 0x3e2   :  { %v1026_v13 = vmul.f32 %v2514_v14, %v1018_v10 }
 0x3e3   :  { %v2593_v35 = vpop.eup %1892  ;;  %v1317_v39 = vmul.f32 1.442695, %v1307_v23 }
 0x3e4   :  { %v1041_v33 = vpack.c.bf16 %v1026_v13, %v1025_v55  ;;  %1034 = vst.msk [vmem:[#allocation7 + $0x18] sm:$0xff] %vm208_vm1, %v1026_v13  ;;  %v1332_v28 = vsel %vm208_vm1, %v2593_v35, 0.0 }
 0x3e5   :  { %1896 = vpow2.f32 %v1317_v39  ;;  %1333 = vadd.xlane.f32.xlu0 %v1332_v28 }
 0x3e6   :  { %1710 = vmatmul.msk.bf16.vlgmr.msra.gmra.mxu3 %vm208_vm1, %v1041_v33 }
 0x3e7   :  { %v1895_v45 = vpop.eup %1894 }
 0x3e8   :  { %v1019_v48 = vmul.f32 0.17677669, %v1895_v45  ;;  %v996_v1 = vpop.xlane.xlu0 %995  ;;  %v1292_v43 = vpop.xlane.xlu2 %1291 }
 0x3e9   :  { %1898 = vrcp.f32 %v996_v1  ;;  %v1308_v14 = vsub.f32 %v2521_v59, %v1292_v43  ;;  %v367_v49 = vpop.f32.mrf.mxu2 }
 0x3ea   :  { %v1027_v9 = vmul.f32 %v2527_v15, %v1019_v48 }
 0x3eb   :  { %v2601_v51 = vpop.eup %1896  ;;  %v1319_v54 = vmul.f32 1.442695, %v1308_v14 }
 0x3ec   :  { %1035 = vst.msk [vmem:[#allocation7 + $0x28] sm:$0xff] %vm208_vm1, %v1027_v9  ;;  %v1335_v42 = vsel %vm208_vm1, %v2601_v51, 0.0 }
 0x3ed   :  { %1900 = vpow2.f32 %v1319_v54  ;;  %1336 = vadd.xlane.f32.xlu1 %v1335_v42 }
 0x3ef   :  { %v1899_v56 = vpop.eup %1898 }
 0x3f0   :  { %v1020_v57 = vmul.f32 0.17677669, %v1899_v56  ;;  %v999_v22 = vpop.xlane.xlu0 %998  ;;  %v1295_v25 = vpop.xlane.xlu2 %1294 }
 0x3f1   :  { %1902 = vrcp.f32 %v999_v22  ;;  %v1309_v59 = vsub.f32 %v2533_v50, %v1295_v25  ;;  %v369_v36 = vpop.f32.mrf.mxu2  ;;  %v2646_v56 = vpop.f32.mrf.mxu3  ;;  %v1791_v25 = vld [vmem:[#allocation5 + $0x58] sm:$0xff] }
 0x3f2   :  { %v1028_v15 = vmul.f32 %v2538_v34, %v1020_v57  ;;  %v383_v60 = vpack.c.bf16 %v369_v36, %v367_v49  ;;  %1139 = vmatpush.bf16.msra.mxu2 %v1791_v25  ;;  %v1793_v25 = vld [vmem:[#allocation5 + $0x68] sm:$0xff] }
 0x3f3   :  { %v2608_v41 = vpop.eup %1900  ;;  %v1321_v0 = vmul.f32 1.442695, %v1309_v59  ;;  %v1789_v59 = vld [vmem:[#allocation5 + $0x48] sm:$0xff] }
 0x3f4   :  { %1036 = vst.msk [vmem:[#allocation7 + $0x38] sm:$0xff] %vm208_vm1, %v1028_v15  ;;  %1689 = vmatmul.msk.bf16.gmra.mxu2 %vm208_vm1, %v383_v60  ;;  %v1338_v37 = vsel %vm208_vm1, %v2608_v41, 0.0  ;;  %v1042_v3 = vpack.c.bf16 %v1028_v15, %v1027_v9 }
 0x3f5   :  { %1904 = vpow2.f32 %v1321_v0  ;;  %1339 = vadd.xlane.f32.xlu2 %v1338_v37 }
 0x3f6   :  { %1711 = vmatmul.msk.bf16.gmra.mxu3 %vm208_vm1, %v1042_v3 }
 0x3f7   :  { %v1903_v50 = vpop.eup %1902 }
 0x3f8   :  { %v1021_v4 = vmul.f32 0.17677669, %v1903_v50  ;;  %v1298_v17 = vpop.xlane.xlu0 %1297  ;;  %v1002_v34 = vpop.xlane.xlu1 %1001 }
 0x3f9   :  { %v1310_v58 = vsub.f32 %v2550_v44, %v1298_v17  ;;  %1906 = vrcp.f32 %v1002_v34  ;;  %v372_v52 = vpop.f32.mrf.mxu2 }
 0x3fa   :  { %v1029_v16 = vmul.f32 %v2548_v38, %v1021_v4 }
 0x3fb   :  { %v2617_v30 = vpop.eup %1904  ;;  %v1323_v8 = vmul.f32 1.442695, %v1310_v58 }
 0x3fc   :  { %1037 = vst.msk [vmem:[#allocation7 + $0x48] sm:$0xff] %vm208_vm1, %v1029_v16  ;;  %v1341_v20 = vsel %vm208_vm1, %v2617_v30, 0.0 }
 0x3fd   :  { %1908 = vpow2.f32 %v1323_v8  ;;  %1342 = vadd.xlane.f32.xlu0 %v1341_v20 }
 0x3ff   :  { %v1907_v11 = vpop.eup %1906 }
 0x400   :  { %v1022_v24 = vmul.f32 0.17677669, %v1907_v11  ;;  %v1301_v32 = vpop.xlane.xlu0 %1300  ;;  %v1005_v40 = vpop.xlane.xlu1 %1004 }
 0x401   :  { %v1311_v44 = vsub.f32 %v2564_v29, %v1301_v32  ;;  %1910 = vrcp.f32 %v1005_v40  ;;  %v374_v55 = vpop.f32.mrf.mxu2 }
 0x402   :  { %v1030_v38 = vmul.f32 %v2559_v21, %v1022_v24  ;;  %v384_v12 = vpack.c.bf16 %v374_v55, %v372_v52 }
 0x403   :  { %v2624_v5 = vpop.eup %1908  ;;  %v1325_v10 = vmul.f32 1.442695, %v1311_v44 }
 0x404   :  { %1038 = vst.msk [vmem:[#allocation7 + $0x58] sm:$0xff] %vm208_vm1, %v1030_v38  ;;  %1690 = vmatmul.msk.bf16.gmra.mxu2 %vm208_vm1, %v384_v12  ;;  %v1344_v31 = vsel %vm208_vm1, %v2624_v5, 0.0  ;;  %v1043_v53 = vpack.c.bf16 %v1030_v38, %v1029_v16 }
 0x405   :  { %1912 = vpow2.f32 %v1325_v10  ;;  %1345 = vadd.xlane.f32.xlu1 %v1344_v31 }
 0x406   :  { %1712 = vmatmul.msk.bf16.gmra.mxu3 %vm208_vm1, %v1043_v53 }
 0x407   :  { %v1911_v29 = vpop.eup %1910 }
 0x408   :  { %v1023_v23 = vmul.f32 0.17677669, %v1911_v29  ;;  %v1304_v13 = vpop.xlane.xlu1 %1303  ;;  %v1008_v21 = vpop.xlane.xlu2 %1007 }
 0x409   :  { %v1312_v39 = vsub.f32 %v2574_v6, %v1304_v13  ;;  %1914 = vrcp.f32 %v1008_v21  ;;  %v377_v33 = vpop.f32.mrf.mxu2 }
 0x40a   :  { %v1031_v28 = vmul.f32 %v2570_v63, %v1023_v23 }
 0x40b   :  { %v2633_v45 = vpop.eup %1912  ;;  %v1327_v48 = vmul.f32 1.442695, %v1312_v39 }
 0x40c   :  { %1039 = vst.msk [vmem:[#allocation7 + $0x68] sm:$0xff] %vm208_vm1, %v1031_v28  ;;  %v1347_v1 = vsel %vm208_vm1, %v2633_v45, 0.0 }
 0x40d   :  { %1916 = vpow2.f32 %v1327_v48  ;;  %1348 = vadd.xlane.f32.xlu2 %v1347_v1 }
 0x40f   :  { %v1915_v43 = vpop.eup %1914 }
 0x410   :  { %v1024_v14 = vmul.f32 0.17677669, %v1915_v43  ;;  %v1331_v57 = vpop.xlane.xlu2 %1330 }
 0x411   :  { %v379_v49 = vpop.f32.mrf.mxu2  ;;  %1918 = vrcp.f32 %v1331_v57 }
 0x412   :  { %v1032_v9 = vmul.f32 %v2579_v46, %v1024_v14  ;;  %v385_v6 = vpack.c.bf16 %v379_v49, %v377_v33  ;;  %v2650_v46 = vpop.f32.mrf.mxu3 }
 0x413   :  { %v2639_v54 = vpop.eup %1916 }
 0x414   :  { %1040 = vst.msk [vmem:[#allocation7 + $0x78] sm:$0xff] %vm208_vm1, %v1032_v9  ;;  %1691 = vmatmul.msk.bf16.gmra.mxu2 %vm208_vm1, %v385_v6  ;;  %v1350_v63 = vsel %vm208_vm1, %v2639_v54, 0.0  ;;  %v1044_v42 = vpack.c.bf16 %v1032_v9, %v1031_v28 }
 0x415   :  { %1351 = vadd.xlane.f32.xlu0 %v1350_v63 }
 0x416   :  { %1713 = vmatmul.msk.bf16.gmra.mxu3 %vm208_vm1, %v1044_v42 }
 0x417   :  { %v1919_v22 = vpop.eup %1918 }
 0x41e   :  { %607 = vrot.lane.b32.xlu1 %v2338_v7, %s2039_s29  ;;  %v2662_v7 = vpop.f32.mrf.mxu3 }
 0x425   :  { %609 = vrot.lane.b32.xlu2 %v2341_v2, %s2039_s29  ;;  %v1361_v2 = vmul.f32 0.17677669, %v1919_v22 }
 0x426   :  { %615 = vrot.lane.b32.xlu1 %v2367_v26, %s2039_s29 }
 0x427   :  { %v1369_v26 = vmul.f32 %v2584_v62, %v1361_v2  ;;  %v1794_v2 = vld [vmem:[#allocation5 + $0x70] sm:$0xff] }
 0x429   :  { %611 = vrot.lane.b32.xlu0 %v2353_v18, %s2039_s29  ;;  %v2669_v18 = vpop.f32.mrf.mxu3 }
 0x42d   :  { %613 = vrot.lane.b32.xlu2 %v2356_v19, %s2039_s29 }
 0x42e   :  { %621 = vrot.lane.b32.xlu1 %v2387_v47, %s2039_s29  ;;  %v1790_v47 = vld [vmem:[#allocation5 + $0x50] sm:$0xff] }
 0x42f   :  { %1140 = vmatpush.bf16.msra.mxu2 %v1790_v47 }
 0x431   :  { %617 = vrot.lane.b32.xlu0 %v2370_v27, %s2039_s29  ;;  %v2672_v19 = vpop.f32.mrf.mxu3  ;;  %v1788_v27 = vld [vmem:[#allocation5 + $0x40] sm:$0xff] }
 0x433   :  { %1141 = vmatpush.bf16.msra.mxu2 %v1789_v59 }
 0x435   :  { %619 = vrot.lane.b32.xlu2 %v2384_v61, %s2039_s29 }
 0x437   :  { %1142 = vmatpush.bf16.msra.mxu2 %v1788_v27 }
 0x439   :  { %1385 = vrot.lane.b32.xlu0 %v1369_v26, %s2039_s29  ;;  %v2674_v36 = vpop.f32.mrf.mxu3 }
 0x441   :  { %v2676_v15 = vpop.f32.mrf.mxu3 }
 0x449   :  { %v2678_v37 = vpop.f32.mrf.mxu3 }
 0x458   :  { %v1334_v61 = vpop.xlane.xlu0 %1333 }
 0x459   :  { %1920 = vrcp.f32 %v1334_v61 }
 0x45f   :  { %v1921_v62 = vpop.eup %1920 }
 0x460   :  { %v1362_v60 = vmul.f32 0.17677669, %v1921_v62  ;;  %v1337_v0 = vpop.xlane.xlu1 %1336  ;;  %v1792_v62 = vld [vmem:[#allocation5 + $0x60] sm:$0xff] }
 0x461   :  { %1922 = vrcp.f32 %v1337_v0  ;;  %v808_v0 = vpop.f32.mrf.mxu2 }
 0x462   :  { %v1370_v3 = vmul.f32 %v2593_v35, %v1362_v60 }
 0x464   :  { %1387 = vrot.lane.b32.xlu2 %v1370_v3, %s2039_s29  ;;  %v1417_v50 = vpack.c.bf16 %v1370_v3, %v1369_v26 }
 0x466   :  { %1752 = vmatmul.msk.bf16.vlgmr.msrb.gmra.mxu3 %vm208_vm1, %v1417_v50 }
 0x467   :  { %v1923_v4 = vpop.eup %1922 }
 0x468   :  { %v1363_v17 = vmul.f32 0.17677669, %v1923_v4  ;;  %v1340_v34 = vpop.xlane.xlu2 %1339 }
 0x469   :  { %1924 = vrcp.f32 %v1340_v34  ;;  %v1066_v58 = vpop.f32.mrf.mxu3  ;;  %v810_v4 = vpop.f32.mrf.mxu2 }
 0x46a   :  { %v1371_v52 = vmul.f32 %v2601_v51, %v1363_v17 }
 0x46c   :  { %1389 = vrot.lane.b32.xlu1 %v1371_v52, %s2039_s29 }
 0x46f   :  { %v1925_v16 = vpop.eup %1924 }
 0x470   :  { %v1364_v8 = vmul.f32 0.17677669, %v1925_v16  ;;  %v1343_v20 = vpop.xlane.xlu0 %1342 }
 0x471   :  { %1926 = vrcp.f32 %v1343_v20  ;;  %v1068_v11 = vpop.f32.mrf.mxu3 }
 0x472   :  { %v1086_v35 = vpack.c.bf16 %v1068_v11, %v1066_v58  ;;  %v1372_v24 = vmul.f32 %v2608_v41, %v1364_v8 }
 0x474   :  { %1730 = vmatmul.msk.bf16.vlgmr.msra.gmra.mxu2 %vm208_vm1, %v1086_v35  ;;  %1391 = vrot.lane.b32.xlu0 %v1372_v24, %s2039_s29  ;;  %v1418_v32 = vpack.c.bf16 %v1372_v24, %v1371_v52 }
 0x476   :  { %1753 = vmatmul.msk.bf16.gmra.mxu3 %vm208_vm1, %v1418_v32 }
 0x477   :  { %v1927_v40 = vpop.eup %1926  ;;  %v813_v58 = vpop.f32.mrf.mxu2 }
 0x478   :  { %v1365_v44 = vmul.f32 0.17677669, %v1927_v40  ;;  %v1346_v51 = vpop.xlane.xlu1 %1345 }
 0x479   :  { %1928 = vrcp.f32 %v1346_v51  ;;  %v1071_v55 = vpop.f32.mrf.mxu3 }
 0x47a   :  { %v1373_v38 = vmul.f32 %v2617_v30, %v1365_v44 }
 0x47c   :  { %1393 = vrot.lane.b32.xlu2 %v1373_v38, %s2039_s29 }
 0x47f   :  { %v1929_v12 = vpop.eup %1928  ;;  %v815_v20 = vpop.f32.mrf.mxu2 }
 0x480   :  { %v1366_v10 = vmul.f32 0.17677669, %v1929_v12  ;;  %v1349_v31 = vpop.xlane.xlu2 %1348 }
 0x481   :  { %1930 = vrcp.f32 %v1349_v31  ;;  %v1073_v41 = vpop.f32.mrf.mxu3 }
 0x482   :  { %v1087_v53 = vpack.c.bf16 %v1073_v41, %v1071_v55  ;;  %v1374_v29 = vmul.f32 %v2624_v5, %v1366_v10  ;;  %v1795_v5 = vld [vmem:[#allocation5 + $0x78] sm:$0xff] }
 0x483   :  { %1515 = vmatpush.bf16.msrb.mxu2 %v1795_v5  ;;  %v809_v5 = vadd.f32 %v808_v0, %v2646_v56  ;;  %v816_v56 = vadd.f32 %v815_v20, %v2669_v18 }
 0x484   :  { %1395 = vrot.lane.b32.xlu1 %v1374_v29, %s2039_s29  ;;  %v1419_v23 = vpack.c.bf16 %v1374_v29, %v1373_v38  ;;  %1731 = vmatmul.msk.bf16.gmra.mxu2 %vm208_vm1, %v1087_v53 }
 0x486   :  { %1754 = vmatmul.msk.bf16.gmra.mxu3 %vm208_vm1, %v1419_v23 }
 0x487   :  { %v1931_v13 = vpop.eup %1930  ;;  %1516 = vmatpush.bf16.msrb.mxu2 %v1794_v2  ;;  %v818_v40 = vpop.f32.mrf.mxu2 }
 0x488   :  { %v1367_v30 = vmul.f32 0.17677669, %v1931_v13  ;;  %v1352_v21 = vpop.xlane.xlu0 %1351  ;;  %v610_v39 = vpop.permute.xlu2 %609 }
 0x489   :  { %1932 = vrcp.f32 %v1352_v21  ;;  %633 = vst.msk [vmem:[#allocation7 + $0x10] sm:$0xff] %vm631_vm2, %v610_v39  ;;  %v1076_v33 = vpop.f32.mrf.mxu3 }
 0x48a   :  { %v1375_v28 = vmul.f32 %v2633_v45, %v1367_v30 }
 0x48b   :  { %1517 = vmatpush.bf16.msrb.mxu2 %v1793_v25 }
 0x48c   :  { %1397 = vrot.lane.b32.xlu0 %v1375_v28, %s2039_s29 }
 0x48f   :  { %v1933_v48 = vpop.eup %1932  ;;  %1518 = vmatpush.bf16.msrb.mxu2 %v1792_v62  ;;  %v820_v51 = vpop.f32.mrf.mxu2 }
 0x490   :  { %v1368_v1 = vmul.f32 0.17677669, %v1933_v48  ;;  %v608_v43 = vpop.permute.xlu1 %607  ;;  %v614_v14 = vpop.permute.xlu2 %613 }
 0x491   :  { %632 = vst.msk [vmem:[#allocation7] sm:$0xff] %vm631_vm2, %v608_v43  ;;  %v1078_v49 = vpop.f32.mrf.mxu3 }
 0x492   :  { %635 = vst.msk [vmem:[#allocation7 + $0x30] sm:$0xff] %vm631_vm2, %v614_v14  ;;  %v1088_v9 = vpack.c.bf16 %v1078_v49, %v1076_v33  ;;  %v1376_v6 = vmul.f32 %v2639_v54, %v1368_v1  ;;  %v811_v14 = vadd.f32 %v810_v4, %v2650_v46  ;;  %v819_v46 = vadd.f32 %v818_v40, %v2672_v19 }
 0x494   :  { %1732 = vmatmul.msk.bf16.gmra.mxu2 %vm208_vm1, %v1088_v9  ;;  %1399 = vrot.lane.b32.xlu2 %v1376_v6, %s2039_s29  ;;  %v1420_v45 = vpack.c.bf16 %v1376_v6, %v1375_v28  ;;  %s1560_s29 = sshll.u32 %s2042_s2, 4  ;;  %s1561_s29 = int_to_ptr.vmem [resolvable:$true] %s1560_s29 }
 0x496   :  { %1755 = vmatmul.msk.bf16.gmra.mxu3 %vm208_vm1, %v1420_v45  ;;  %v814_v45 = vadd.f32 %v813_v58, %v2662_v7  ;;  %v821_v7 = vadd.f32 %v820_v51, %v2674_v36 }
 0x497   :  { %v823_v12 = vpop.f32.mrf.mxu2 }
 0x498   :  { %v616_v63 = vpop.permute.xlu1 %615  ;;  %v620_v42 = vpop.permute.xlu2 %619  ;;  %v824_v18 = vadd.f32 %v823_v12, %v2676_v15 }
 0x499   :  { %636 = vst.msk [vmem:[#allocation7 + $0x40] sm:$0xff] %vm631_vm2, %v616_v63  ;;  %v1081_v57 = vpop.f32.mrf.mxu3 }
 0x49a   :  { %638 = vst.msk [vmem:[#allocation7 + $0x60] sm:$0xff] %vm631_vm2, %v620_v42 }
 0x49b   :  { %v612_v22 = vpop.permute.xlu0 %611 }
 0x49c   :  { %634 = vst.msk [vmem:[#allocation7 + $0x20] sm:$0xff] %vm631_vm2, %v612_v22 }
 0x49f   :  { %v825_v31 = vpop.f32.mrf.mxu2 }
 0x4a0   :  { %v622_v26 = vpop.permute.xlu1 %621  ;;  %v826_v19 = vadd.f32 %v825_v31, %v2678_v37 }
 0x4a1   :  { %639 = vst.msk [vmem:[#allocation7 + $0x70] sm:$0xff] %vm631_vm2, %v622_v26  ;;  %v1083_v54 = vpop.f32.mrf.mxu3 }
 0x4a2   :  { %v1089_v47 = vpack.c.bf16 %v1083_v54, %v1081_v57 }
 0x4a3   :  { %v618_v59 = vpop.permute.xlu0 %617 }
 0x4a4   :  { %637 = vst.msk [vmem:[#allocation7 + $0x50] sm:$0xff] %vm631_vm2, %v618_v59  ;;  %1733 = vmatmul.msk.bf16.gmra.mxu2 %vm208_vm1, %v1089_v47 }
 0x4ab   :  { %v1386_v27 = vpop.permute.xlu0 %1385 }
 0x4ac   :  { %1409 = vst.msk [vmem:[#allocation7 + $0x8] sm:$0xff] %vm631_vm2, %v1386_v27 }
 0x4be   :  { %v1388_v61 = vpop.permute.xlu2 %1387 }
 0x4bf   :  { %1410 = vst.msk [vmem:[#allocation7 + $0x18] sm:$0xff] %vm631_vm2, %v1388_v61 }
 0x4d6   :  { %v1394_v60 = vpop.permute.xlu2 %1393 }
 0x4d7   :  { %1413 = vst.msk [vmem:[#allocation7 + $0x48] sm:$0xff] %vm631_vm2, %v1394_v60 }
 0x4de   :  { %v1390_v3 = vpop.permute.xlu1 %1389 }
 0x4df   :  { %1411 = vst.msk [vmem:[#allocation7 + $0x28] sm:$0xff] %vm631_vm2, %v1390_v3 }
 0x4e6   :  { %v1392_v50 = vpop.permute.xlu0 %1391 }
 0x4e7   :  { %1412 = vst.msk [vmem:[#allocation7 + $0x38] sm:$0xff] %vm631_vm2, %v1392_v50 }
 0x4e9   :  { %v1442_v17 = vpop.f32.mrf.mxu3 }
 0x4ee   :  { %v1400_v34 = vpop.permute.xlu2 %1399 }
 0x4ef   :  { %1416 = vst.msk [vmem:[#allocation7 + $0x78] sm:$0xff] %vm631_vm2, %v1400_v34 }
 0x4f1   :  { %v1444_v52 = vpop.f32.mrf.mxu3 }
 0x4f2   :  { %v1462_v16 = vpack.c.bf16 %v1444_v52, %v1442_v17 }
 0x4f4   :  { %1772 = vmatmul.msk.bf16.vlgmr.msrb.gmra.mxu2 %vm208_vm1, %v1462_v16 }
 0x4f6   :  { %v1396_v8 = vpop.permute.xlu1 %1395 }
 0x4f7   :  { %1414 = vst.msk [vmem:[#allocation7 + $0x58] sm:$0xff] %vm631_vm2, %v1396_v8  ;;  %v1144_v29 = vpop.f32.mrf.mxu2 }
 0x4f8   :  { %v1164_v48 = vadd.f32 %v1144_v29, %v809_v5 }
 0x4f9   :  { %v1447_v11 = vpop.f32.mrf.mxu3 }
 0x4fe   :  { %v1398_v35 = vpop.permute.xlu0 %1397 }
 0x4ff   :  { %1415 = vst.msk [vmem:[#allocation7 + $0x68] sm:$0xff] %vm631_vm2, %v1398_v35  ;;  %v1146_v23 = vpop.f32.mrf.mxu2 }
 0x500   :  { %1568 = dma.vmem_to_hbm [thread:$0]  %s1561_s29, 2048, %s1563_s18, [#allocation4], %s2043_s19, %s2043_s19, %s2044_s20   ;;  %v1165_v49 = vadd.f32 %v1146_v23, %v811_v14 }
 0x501   :  { %v1449_v24 = vpop.f32.mrf.mxu3 }
 0x502   :  { %v1463_v32 = vpack.c.bf16 %v1449_v24, %v1447_v11 }
 0x504   :  { %1773 = vmatmul.msk.bf16.gmra.mxu2 %vm208_vm1, %v1463_v32 }
 0x507   :  { %v1149_v13 = vpop.f32.mrf.mxu2 }
 0x508   :  { %v1166_v63 = vadd.f32 %v1149_v13, %v814_v45 }
 0x509   :  { %v1452_v44 = vpop.f32.mrf.mxu3 }
 0x50f   :  { %v1151_v30 = vpop.f32.mrf.mxu2 }
 0x510   :  { %v1167_v22 = vadd.f32 %v1151_v30, %v816_v56 }
 0x511   :  { %v1454_v55 = vpop.f32.mrf.mxu3 }
 0x512   :  { %v1464_v38 = vpack.c.bf16 %v1454_v55, %v1452_v44 }
 0x514   :  { %1774 = vmatmul.msk.bf16.gmra.mxu2 %vm208_vm1, %v1464_v38 }
 0x517   :  { %v1154_v21 = vpop.f32.mrf.mxu2 }
 0x518   :  { %v1168_v54 = vadd.f32 %v1154_v21, %v819_v46 }
 0x519   :  { %v1457_v10 = vpop.f32.mrf.mxu3 }
 0x51f   :  { %v1156_v39 = vpop.f32.mrf.mxu2 }
 0x520   :  { %v1169_v59 = vadd.f32 %v1156_v39, %v821_v7 }
 0x521   :  { %v1459_v41 = vpop.f32.mrf.mxu3 }
 0x522   :  { %v1465_v53 = vpack.c.bf16 %v1459_v41, %v1457_v10 }
 0x524   :  { %1775 = vmatmul.msk.bf16.gmra.mxu2 %vm208_vm1, %v1465_v53 }
 0x527   :  { %v1159_v33 = vpop.f32.mrf.mxu2 }
 0x528   :  { %v1170_v62 = vadd.f32 %v1159_v33, %v824_v18 }
 0x52f   :  { %v1161_v28 = vpop.f32.mrf.mxu2 }
 0x530   :  { %v1171_v36 = vadd.f32 %v1161_v28, %v826_v19 }
 0x577   :  { %v1520_v1 = vpop.f32.mrf.mxu2 }
 0x578   :  { %v1540_v43 = vadd.f32 %v1520_v1, %v1164_v48 }
 0x57a   :  { %1548 = vst.msk [vmem:[#allocation8] sm:$0xff] %vm208_vm1, %v1540_v43 }
 0x57f   :  { %v1522_v9 = vpop.f32.mrf.mxu2 }
 0x580   :  { %v1541_v6 = vadd.f32 %v1522_v9, %v1165_v49 }
 0x582   :  { %1549 = vst.msk [vmem:[#allocation8 + $0x8] sm:$0xff] %vm208_vm1, %v1541_v6 }
 0x587   :  { %v1525_v42 = vpop.f32.mrf.mxu2 }
 0x588   :  { %v1542_v57 = vadd.f32 %v1525_v42, %v1166_v63 }
 0x58a   :  { %1550 = vst.msk [vmem:[#allocation8 + $0x10] sm:$0xff] %vm208_vm1, %v1542_v57 }
 0x58f   :  { %v1527_v2 = vpop.f32.mrf.mxu2 }
 0x590   :  { %v1543_v26 = vadd.f32 %v1527_v2, %v1167_v22 }
 0x592   :  { %1551 = vst.msk [vmem:[#allocation8 + $0x18] sm:$0xff] %vm208_vm1, %v1543_v26 }
 0x597   :  { %v1530_v25 = vpop.f32.mrf.mxu2 }
 0x598   :  { %v1544_v47 = vadd.f32 %v1530_v25, %v1168_v54 }
 0x59a   :  { %1552 = vst.msk [vmem:[#allocation8 + $0x20] sm:$0xff] %vm208_vm1, %v1544_v47 }
 0x59f   :  { %v1532_v27 = vpop.f32.mrf.mxu2 }
 0x5a0   :  { %v1545_v61 = vadd.f32 %v1532_v27, %v1169_v59 }
 0x5a2   :  { %1553 = vst.msk [vmem:[#allocation8 + $0x28] sm:$0xff] %vm208_vm1, %v1545_v61 }
 0x5a7   :  { %v1535_v60 = vpop.f32.mrf.mxu2 }
 0x5a8   :  { %v1546_v0 = vadd.f32 %v1535_v60, %v1170_v62 }
 0x5aa   :  { %1554 = vst.msk [vmem:[#allocation8 + $0x30] sm:$0xff] %vm208_vm1, %v1546_v0 }
 0x5af   :  { %v1537_v3 = vpop.f32.mrf.mxu2 }
 0x5b0   :  { %v1547_v50 = vadd.f32 %v1537_v3, %v1171_v36 }
 0x5b2   :  { %1555 = vst.msk [vmem:[#allocation8 + $0x38] sm:$0xff] %vm208_vm1, %v1547_v50 }
 0x5b3   :  { %1581 = dma.vmem_to_hbm [thread:$0]  %s1574_s21, 1024, %s1576_s24, [#allocation9], %s2046_s25, %s2046_s25, %s2047_s26  }
 0x5b4   :  { %2034 = dma.done.wait [#allocation4], 2048  }
 0x5b5   :  { %2035 = vsyncadd [#allocation4], 4294965248 }
 0x5b6   :  { %2036 = dma.done.wait [#allocation9], 1024  }
 0x5b7   :  { %2037 = vsyncadd [#allocation9], 4294966272 }
 0x5b8   :  { %1590 = vsyncpa [#allocation3], 1 }
 0x5b9   :  { %1591 = vsyncpa [#allocation6], 1 }
 0x5ba   :  { %1592 = vsyncpa [#allocation4], 1 }
 0x5bb   :  { %1593 = vsyncpa [#allocation9], 1 }

</bundles_post_ra>
